<compile_context>
chip_gen: v7x
topology: tpu7x:2x2x1
jax: 0.10.0
libtpu: 0.0.40
codegen_flags: <defaults>
</compile_context>

<pallas_src>
import jax
import jax.numpy as jnp
from jax import lax
from jax.experimental import pallas as pl
from jax.experimental.pallas import tpu as pltpu

# Problem sizes (small, per instructions).
N, H, W = 2, 16, 16
PLANES = 4
WIDTH = PLANES              # base_width=64, groups=1 -> width = planes
INPLANES = PLANES * 4       # expansion = 4; identity path requires Cin == Cout
COUT = PLANES * 4
NH = N * H                  # 32 rows in z layout
NHW = N * H * W             # 512 spatial positions
EPS = 1e-5
SLOT = 128                  # lane-aligned slot width for the im2col scratch


def bottleneck_kernel(x_ref, w1_ref, w2_ref, w3_ref,
                      f4_ref, f4t_ref, f16_ref, f16t_ref,
                      g1_ref, b1_ref, g2_ref, b2_ref, g3_ref, b3_ref,
                      o_ref, pad_ref, taps_ref):
    inv_nhw = 1.0 / float(NHW)

    def bn(y, f_ref, ft_ref, g_ref, b_ref):
        # y: (NH, W*C) z-layout slab. Training-mode BN, single pass.
        s = jnp.dot(jnp.sum(y, axis=0, keepdims=True), f_ref[...],
                    preferred_element_type=jnp.float32)               # (1, C)
        ss = jnp.dot(jnp.sum(y * y, axis=0, keepdims=True), f_ref[...],
                     preferred_element_type=jnp.float32)              # (1, C)
        mean = s * inv_nhw
        var = ss * inv_nhw - mean * mean                              # biased
        a_c = g_ref[...] * lax.rsqrt(var + EPS)                       # (1, C)
        b_c = b_ref[...] - mean * a_c                                 # (1, C)
        a_t = jnp.dot(a_c, ft_ref[...], preferred_element_type=jnp.float32)
        b_t = jnp.dot(b_c, ft_ref[...], preferred_element_type=jnp.float32)
        return y * a_t + b_t                                          # (NH, W*C)

    x = x_ref[...]                                                    # (32, 256)

    # --- conv1 (1x1): one block-diagonal matmul, K = W*INPLANES = 256 --------
    y = jnp.dot(x, w1_ref[...], preferred_element_type=jnp.float32)   # (32, 64)
    y = jnp.maximum(bn(y, f4_ref, f4t_ref, g1_ref, b1_ref), 0.0)

    # --- conv2 (3x3, pad=1): single im2col matmul ----------------------------
    # Only the three dy row-shifts are materialized; dx shifts + cin are baked
    # into the banded weight matrix (zero blocks handle the W boundary).
    zrow = jnp.zeros((1, W * WIDTH), jnp.float32)
    pad_ref[0:1, :] = zrow                       # zero the 1-row halos only
    pad_ref[NH + 1:NH + 2, :] = zrow
    pad_ref[1:NH + 1, :] = y

    taps_ref[...] = jnp.zeros_like(taps_ref)     # tiny (32, 384) scratch
    h_idx = lax.broadcasted_iota(jnp.int32, (NH, 1), 0) % H
    for dy in range(3):                          # static unroll
        tap = pad_ref[dy:dy + NH, :]             # y shifted by (dy - 1) rows
        if dy == 0:                              # reading row above: need h >= 1
            tap = jnp.where(h_idx >= 1, tap, 0.0)
        elif dy == 2:                            # reading row below: need h <= H-2
            tap = jnp.where(h_idx <= H - 2, tap, 0.0)
        taps_ref[:, SLOT * dy:SLOT * dy + W * WIDTH] = tap   # lane-aligned slot

    y = jnp.dot(taps_ref[...], w2_ref[...],
                preferred_element_type=jnp.float32)           # (32, 64)
    y = jnp.maximum(bn(y, f4_ref, f4t_ref, g2_ref, b2_ref), 0.0)

    # --- conv3 (1x1): one block-diagonal matmul + bn3 ------------------------
    y = jnp.dot(y, w3_ref[...], preferred_element_type=jnp.float32)   # (32, 256)
    y = bn(y, f16_ref, f16t_ref, g3_ref, b3_ref)

    # --- residual add + relu; (32, 256) store is fully lane-dense ------------
    o_ref[...] = jnp.maximum(y + x, 0.0).astype(o_ref.dtype)


def bottleneck_forward(x_nchw, params):
    """x_nchw: (N, INPLANES, H, W) float32. Returns (N, COUT, H, W)."""
    (w1, g1, b1, w2, g2, b2, w3, g3, b3) = params

    # ---- parameter pre-packing (weight-only transforms, done once in XLA) ----
    eye_w = jnp.eye(W, dtype=jnp.float32)
    w1bd = jnp.kron(eye_w, w1)                         # (W*INPLANES, W*WIDTH) = (256, 64)
    w3bd = jnp.kron(eye_w, w3)                         # (W*WIDTH, W*COUT)     = (64, 256)

    # Banded conv2 matrix: slot dy (128 rows, lane-aligned) holds
    #   M_dy[w_in*WIDTH+cin, w_out*WIDTH+cout] = sum_dx [w_in == w_out+dx-1] * w2[dy,dx,cin,cout]
    w2hwio = w2.reshape(3, 3, WIDTH, WIDTH)            # [dy, dx, cin, cout]
    slots = []
    for dy in range(3):
        m = jnp.zeros((W * WIDTH, W * WIDTH), jnp.float32)
        for dx in range(3):
            m = m + jnp.kron(jnp.eye(W, W, k=1 - dx, dtype=jnp.float32),
                             w2hwio[dy, dx])
        slots.append(jnp.concatenate(
            [m, jnp.zeros((SLOT - W * WIDTH, W * WIDTH), jnp.float32)], axis=0))
    w2big = jnp.concatenate(slots, axis=0)             # (3*128, 64)

    # Channel-fold matrices for BN stats in z layout.
    f4 = jnp.tile(jnp.eye(WIDTH, dtype=jnp.float32), (W, 1))    # (64, 4)
    f16 = jnp.tile(jnp.eye(COUT, dtype=jnp.float32), (W, 1))    # (256, 16)

    # NCHW -> z layout (rows = (n, h), lanes = w*C + c): lane-dense input DMA.
    x_z = jnp.transpose(x_nchw, (0, 2, 3, 1)).reshape(NH, W * INPLANES)

    # Single grid point; all operands are tiny and live whole-array in VMEM
    # (default BlockSpecs), total footprint < 1 MiB.
    out_z = pl.pallas_call(
        bottleneck_kernel,
        out_shape=jax.ShapeDtypeStruct((NH, W * COUT), jnp.float32),
        scratch_shapes=[
            pltpu.VMEM((NH + 2, W * WIDTH), jnp.float32),   # row-halo pad (~20 KB)
            pltpu.VMEM((NH, 3 * SLOT), jnp.float32),        # im2col taps (~48 KB)
        ],
    )(x_z, w1bd, w2big, w3bd, f4, f4.T, f16, f16.T,
      g1, b1, g2, b2, g3, b3)

    out_nhwc = out_z.reshape(N, H, W, COUT)
    return jnp.transpose(out_nhwc, (0, 3, 1, 2))


def _reference_forward(x_nchw, params):
    """Plain-JAX reference (NHWC convs) for correctness checking."""
    (w1, g1, b1, w2, g2, b2, w3, g3, b3) = params
    x = jnp.transpose(x_nchw, (0, 2, 3, 1))

    def bn(y, g, b):
        mu = jnp.mean(y, axis=(0, 1, 2), keepdims=True)
        var = jnp.mean((y - mu) ** 2, axis=(0, 1, 2), keepdims=True)
        return (y - mu) * lax.rsqrt(var + EPS) * g.reshape(1, 1, 1, -1) + b.reshape(1, 1, 1, -1)

    dn = ("NHWC", "HWIO", "NHWC")
    y = lax.conv_general_dilated(x, w1.reshape(1, 1, INPLANES, WIDTH),
                                 (1, 1), "VALID", dimension_numbers=dn)
    y = jnp.maximum(bn(y, g1, b1), 0.0)
    y = lax.conv_general_dilated(y, w2.reshape(3, 3, WIDTH, WIDTH),
                                 (1, 1), ((1, 1), (1, 1)), dimension_numbers=dn)
    y = jnp.maximum(bn(y, g2, b2), 0.0)
    y = lax.conv_general_dilated(y, w3.reshape(1, 1, WIDTH, COUT),
                                 (1, 1), "VALID", dimension_numbers=dn)
    y = bn(y, g3, b3)
    y = jnp.maximum(y + x, 0.0)
    return jnp.transpose(y, (0, 3, 1, 2))


def make_params(key):
    ks = jax.random.split(key, 9)
    w1 = jax.random.normal(ks[0], (INPLANES, WIDTH), jnp.float32) * 0.1
    w2 = jax.random.normal(ks[1], (9, WIDTH, WIDTH), jnp.float32) * 0.1
    w3 = jax.random.normal(ks[2], (WIDTH, COUT), jnp.float32) * 0.1
    g1 = 1.0 + 0.1 * jax.random.normal(ks[3], (1, WIDTH), jnp.float32)
    b1 = 0.1 * jax.random.normal(ks[4], (1, WIDTH), jnp.float32)
    g2 = 1.0 + 0.1 * jax.random.normal(ks[5], (1, WIDTH), jnp.float32)
    b2 = 0.1 * jax.random.normal(ks[6], (1, WIDTH), jnp.float32)
    g3 = 1.0 + 0.1 * jax.random.normal(ks[7], (1, COUT), jnp.float32)
    b3 = 0.1 * jax.random.normal(ks[8], (1, COUT), jnp.float32)
    return (w1, g1, b1, w2, g2, b2, w3, g3, b3)


if __name__ == "__main__":
    key = jax.random.PRNGKey(0)
    kx, kp = jax.random.split(key)
    x = jax.random.normal(kx, (N, INPLANES, H, W), jnp.float32)  # NCHW like PyTorch
    params = make_params(kp)

    out = jax.jit(bottleneck_forward)(x, params)
    out = jax.block_until_ready(out)

    ref = _reference_forward(x, params)
    assert out.shape == (N, COUT, H, W)
    assert jnp.allclose(out, ref, atol=2e-4, rtol=2e-4), "mismatch vs reference"
    print("KERNEL_OK")
</pallas_src>

<mosaic_0001>
module attributes {stable_mosaic.version = 11 : i64} {
  func.func @bottleneck_kernel(%arg0: memref<32x256xf32, #tpu.memory_space<vmem>>, %arg1: memref<256x64xf32, #tpu.memory_space<vmem>>, %arg2: memref<384x64xf32, #tpu.memory_space<vmem>>, %arg3: memref<64x256xf32, #tpu.memory_space<vmem>>, %arg4: memref<64x4xf32, #tpu.memory_space<vmem>>, %arg5: memref<4x64xf32, #tpu.memory_space<vmem>>, %arg6: memref<256x16xf32, #tpu.memory_space<vmem>>, %arg7: memref<16x256xf32, #tpu.memory_space<vmem>>, %arg8: memref<1x4xf32, #tpu.memory_space<vmem>>, %arg9: memref<1x4xf32, #tpu.memory_space<vmem>>, %arg10: memref<1x4xf32, #tpu.memory_space<vmem>>, %arg11: memref<1x4xf32, #tpu.memory_space<vmem>>, %arg12: memref<1x16xf32, #tpu.memory_space<vmem>>, %arg13: memref<1x16xf32, #tpu.memory_space<vmem>>, %arg14: memref<32x256xf32, #tpu.memory_space<vmem>>, %arg15: memref<34x64xf32, #tpu.memory_space<vmem>>, %arg16: memref<32x384xf32, #tpu.memory_space<vmem>>) attributes {dimension_semantics = [], scalar_prefetch = 0 : i64, scratch_operands = 2 : i64, tpu.core_type = #tpu.core_type<tc>} {
    %c0 = arith.constant 0 : index
    %c0_0 = arith.constant 0 : index
    %0 = vector.load %arg0[%c0, %c0_0] : memref<32x256xf32, #tpu.memory_space<vmem>>, vector<32x256xf32>
    %c0_1 = arith.constant 0 : index
    %c0_2 = arith.constant 0 : index
    %1 = vector.load %arg1[%c0_1, %c0_2] : memref<256x64xf32, #tpu.memory_space<vmem>>, vector<256x64xf32>
    %cst = arith.constant dense<0.000000e+00> : vector<32x64xf32>
    %2 = tpu.matmul %0, %1, %cst {dimension_numbers = #tpu.dot_dimension_numbers<[1], [0], [0], [1], [0, 0, 1, 1], [], []>} : vector<32x256xf32>, vector<256x64xf32>, vector<32x64xf32> -> vector<32x64xf32>
    %cst_3 = arith.constant dense<0.000000e+00> : vector<64xf32>
    %3 = vector.multi_reduction <add>, %2, %cst_3 [0] : vector<32x64xf32> to vector<64xf32>
    %4 = vector.shape_cast %3 : vector<64xf32> to vector<1x64xf32>
    %c0_4 = arith.constant 0 : index
    %c0_5 = arith.constant 0 : index
    %5 = vector.load %arg4[%c0_4, %c0_5] : memref<64x4xf32, #tpu.memory_space<vmem>>, vector<64x4xf32>
    %cst_6 = arith.constant dense<0.000000e+00> : vector<1x4xf32>
    %6 = tpu.matmul %4, %5, %cst_6 {dimension_numbers = #tpu.dot_dimension_numbers<[1], [0], [0], [1], [0, 0, 1, 1], [], []>} : vector<1x64xf32>, vector<64x4xf32>, vector<1x4xf32> -> vector<1x4xf32>
    %7 = arith.mulf %2, %2 : vector<32x64xf32>
    %cst_7 = arith.constant dense<0.000000e+00> : vector<64xf32>
    %8 = vector.multi_reduction <add>, %7, %cst_7 [0] : vector<32x64xf32> to vector<64xf32>
    %9 = vector.shape_cast %8 : vector<64xf32> to vector<1x64xf32>
    %c0_8 = arith.constant 0 : index
    %c0_9 = arith.constant 0 : index
    %10 = vector.load %arg4[%c0_8, %c0_9] : memref<64x4xf32, #tpu.memory_space<vmem>>, vector<64x4xf32>
    %cst_10 = arith.constant dense<0.000000e+00> : vector<1x4xf32>
    %11 = tpu.matmul %9, %10, %cst_10 {dimension_numbers = #tpu.dot_dimension_numbers<[1], [0], [0], [1], [0, 0, 1, 1], [], []>} : vector<1x64xf32>, vector<64x4xf32>, vector<1x4xf32> -> vector<1x4xf32>
    %cst_11 = arith.constant 0.001953125 : f32
    %12 = vector.broadcast %cst_11 : f32 to vector<1x4xf32>
    %13 = arith.mulf %6, %12 : vector<1x4xf32>
    %cst_12 = arith.constant 0.001953125 : f32
    %14 = vector.broadcast %cst_12 : f32 to vector<1x4xf32>
    %15 = arith.mulf %11, %14 : vector<1x4xf32>
    %16 = arith.mulf %13, %13 : vector<1x4xf32>
    %17 = arith.subf %15, %16 : vector<1x4xf32>
    %c0_13 = arith.constant 0 : index
    %c0_14 = arith.constant 0 : index
    %18 = vector.load %arg8[%c0_13, %c0_14] : memref<1x4xf32, #tpu.memory_space<vmem>>, vector<1x4xf32>
    %cst_15 = arith.constant 9.99999974E-6 : f32
    %19 = vector.broadcast %cst_15 : f32 to vector<1x4xf32>
    %20 = arith.addf %17, %19 : vector<1x4xf32>
    %21 = math.rsqrt %20 : vector<1x4xf32>
    %22 = arith.mulf %18, %21 : vector<1x4xf32>
    %c0_16 = arith.constant 0 : index
    %c0_17 = arith.constant 0 : index
    %23 = vector.load %arg9[%c0_16, %c0_17] : memref<1x4xf32, #tpu.memory_space<vmem>>, vector<1x4xf32>
    %24 = arith.mulf %13, %22 : vector<1x4xf32>
    %25 = arith.subf %23, %24 : vector<1x4xf32>
    %c0_18 = arith.constant 0 : index
    %c0_19 = arith.constant 0 : index
    %26 = vector.load %arg5[%c0_18, %c0_19] : memref<4x64xf32, #tpu.memory_space<vmem>>, vector<4x64xf32>
    %cst_20 = arith.constant dense<0.000000e+00> : vector<1x64xf32>
    %27 = tpu.matmul %22, %26, %cst_20 {dimension_numbers = #tpu.dot_dimension_numbers<[1], [0], [0], [1], [0, 0, 1, 1], [], []>} : vector<1x4xf32>, vector<4x64xf32>, vector<1x64xf32> -> vector<1x64xf32>
    %c0_21 = arith.constant 0 : index
    %c0_22 = arith.constant 0 : index
    %28 = vector.load %arg5[%c0_21, %c0_22] : memref<4x64xf32, #tpu.memory_space<vmem>>, vector<4x64xf32>
    %cst_23 = arith.constant dense<0.000000e+00> : vector<1x64xf32>
    %29 = tpu.matmul %25, %28, %cst_23 {dimension_numbers = #tpu.dot_dimension_numbers<[1], [0], [0], [1], [0, 0, 1, 1], [], []>} : vector<1x4xf32>, vector<4x64xf32>, vector<1x64xf32> -> vector<1x64xf32>
    %30 = vector.broadcast %27 : vector<1x64xf32> to vector<32x64xf32>
    %31 = arith.mulf %2, %30 : vector<32x64xf32>
    %32 = vector.broadcast %29 : vector<1x64xf32> to vector<32x64xf32>
    %33 = arith.addf %31, %32 : vector<32x64xf32>
    %cst_24 = arith.constant 0.000000e+00 : f32
    %34 = vector.broadcast %cst_24 : f32 to vector<32x64xf32>
    %35 = arith.maximumf %33, %34 : vector<32x64xf32>
    %cst_25 = arith.constant 0.000000e+00 : f32
    %36 = vector.broadcast %cst_25 : f32 to vector<1x64xf32>
    %c0_26 = arith.constant 0 : index
    %c0_27 = arith.constant 0 : index
    %37 = vector.load %arg15[%c0_26, %c0_27] : memref<34x64xf32, #tpu.memory_space<vmem>>, vector<1x64xf32>
    tpu.vector_store %arg15[%c0_26, %c0_27], %36 {strides = array<i32>} : memref<34x64xf32, #tpu.memory_space<vmem>>, vector<1x64xf32>,
    %c33 = arith.constant 33 : index
    %c0_28 = arith.constant 0 : index
    %38 = vector.load %arg15[%c33, %c0_28] : memref<34x64xf32, #tpu.memory_space<vmem>>, vector<1x64xf32>
    tpu.vector_store %arg15[%c33, %c0_28], %36 {strides = array<i32>} : memref<34x64xf32, #tpu.memory_space<vmem>>, vector<1x64xf32>,
    %c1 = arith.constant 1 : index
    %c0_29 = arith.constant 0 : index
    %39 = vector.load %arg15[%c1, %c0_29] : memref<34x64xf32, #tpu.memory_space<vmem>>, vector<32x64xf32>
    tpu.vector_store %arg15[%c1, %c0_29], %35 {strides = array<i32>} : memref<34x64xf32, #tpu.memory_space<vmem>>, vector<32x64xf32>,
    %cst_30 = arith.constant 0.000000e+00 : f32
    %40 = vector.broadcast %cst_30 : f32 to vector<32x384xf32>
    %c0_31 = arith.constant 0 : index
    %c0_32 = arith.constant 0 : index
    %41 = vector.load %arg16[%c0_31, %c0_32] : memref<32x384xf32, #tpu.memory_space<vmem>>, vector<32x384xf32>
    tpu.vector_store %arg16[%c0_31, %c0_32], %40 {strides = array<i32>} : memref<32x384xf32, #tpu.memory_space<vmem>>, vector<32x384xf32>,
    %42 = tpu.iota {dimensions = array<i32: 0>} : vector<32x1xi32>
    %c16_i32 = arith.constant 16 : i32
    %c0_i32 = arith.constant 0 : i32
    %43 = arith.cmpi eq, %c16_i32, %c0_i32 : i32
    %c1_i32 = arith.constant 1 : i32
    %44 = arith.select %43, %c1_i32, %c16_i32 : i32
    %45 = vector.broadcast %44 : i32 to vector<32x1xi32>
    %46 = arith.remsi %42, %45 : vector<32x1xi32>
    %c0_i32_33 = arith.constant 0 : i32
    %47 = vector.broadcast %c0_i32_33 : i32 to vector<32x1xi32>
    %48 = arith.cmpi ne, %46, %47 : vector<32x1xi32>
    %c0_i32_34 = arith.constant 0 : i32
    %49 = vector.broadcast %c0_i32_34 : i32 to vector<32x1xi32>
    %50 = arith.cmpi slt, %46, %49 : vector<32x1xi32>
    %c0_i32_35 = arith.constant 0 : i32
    %51 = arith.cmpi slt, %44, %c0_i32_35 : i32
    %52 = vector.broadcast %51 : i1 to vector<32x1xi1>
    %53 = vector.broadcast %52 : vector<32x1xi1> to vector<32x1xi1>
    %54 = arith.xori %50, %53 : vector<32x1xi1>
    %55 = arith.andi %54, %48 : vector<32x1xi1>
    %56 = vector.broadcast %44 : i32 to vector<32x1xi32>
    %57 = arith.addi %46, %56 : vector<32x1xi32>
    %58 = arith.select %55, %57, %46 : vector<32x1xi1>, vector<32x1xi32>
    %c0_36 = arith.constant 0 : index
    %c0_37 = arith.constant 0 : index
    %59 = vector.load %arg15[%c0_36, %c0_37] : memref<34x64xf32, #tpu.memory_space<vmem>>, vector<32x64xf32>
    %c1_i32_38 = arith.constant 1 : i32
    %60 = vector.broadcast %c1_i32_38 : i32 to vector<32x1xi32>
    %61 = arith.cmpi sge, %58, %60 : vector<32x1xi32>
    %cst_39 = arith.constant 0.000000e+00 : f32
    %62 = vector.shape_cast %61 : vector<32x1xi1> to vector<32x1xi1>
    %63 = vector.broadcast %62 : vector<32x1xi1> to vector<32x64xi1>
    %64 = vector.broadcast %cst_39 : f32 to vector<32x64xf32>
    %65 = arith.select %63, %59, %64 : vector<32x64xi1>, vector<32x64xf32>
    %c0_40 = arith.constant 0 : index
    %c0_41 = arith.constant 0 : index
    %66 = vector.load %arg16[%c0_40, %c0_41] : memref<32x384xf32, #tpu.memory_space<vmem>>, vector<32x64xf32>
    tpu.vector_store %arg16[%c0_40, %c0_41], %65 {strides = array<i32>} : memref<32x384xf32, #tpu.memory_space<vmem>>, vector<32x64xf32>,
    %c1_42 = arith.constant 1 : index
    %c0_43 = arith.constant 0 : index
    %67 = vector.load %arg15[%c1_42, %c0_43] : memref<34x64xf32, #tpu.memory_space<vmem>>, vector<32x64xf32>
    %c0_44 = arith.constant 0 : index
    %c128 = arith.constant 128 : index
    %68 = vector.load %arg16[%c0_44, %c128] : memref<32x384xf32, #tpu.memory_space<vmem>>, vector<32x64xf32>
    tpu.vector_store %arg16[%c0_44, %c128], %67 {strides = array<i32>} : memref<32x384xf32, #tpu.memory_space<vmem>>, vector<32x64xf32>,
    %c2 = arith.constant 2 : index
    %c0_45 = arith.constant 0 : index
    %69 = vector.load %arg15[%c2, %c0_45] : memref<34x64xf32, #tpu.memory_space<vmem>>, vector<32x64xf32>
    %c14_i32 = arith.constant 14 : i32
    %70 = vector.broadcast %c14_i32 : i32 to vector<32x1xi32>
    %71 = arith.cmpi sle, %58, %70 : vector<32x1xi32>
    %cst_46 = arith.constant 0.000000e+00 : f32
    %72 = vector.shape_cast %71 : vector<32x1xi1> to vector<32x1xi1>
    %73 = vector.broadcast %72 : vector<32x1xi1> to vector<32x64xi1>
    %74 = vector.broadcast %cst_46 : f32 to vector<32x64xf32>
    %75 = arith.select %73, %69, %74 : vector<32x64xi1>, vector<32x64xf32>
    %c0_47 = arith.constant 0 : index
    %c256 = arith.constant 256 : index
    %76 = vector.load %arg16[%c0_47, %c256] : memref<32x384xf32, #tpu.memory_space<vmem>>, vector<32x64xf32>
    tpu.vector_store %arg16[%c0_47, %c256], %75 {strides = array<i32>} : memref<32x384xf32, #tpu.memory_space<vmem>>, vector<32x64xf32>,
    %c0_48 = arith.constant 0 : index
    %c0_49 = arith.constant 0 : index
    %77 = vector.load %arg16[%c0_48, %c0_49] : memref<32x384xf32, #tpu.memory_space<vmem>>, vector<32x384xf32>
    %c0_50 = arith.constant 0 : index
    %c0_51 = arith.constant 0 : index
    %78 = vector.load %arg2[%c0_50, %c0_51] : memref<384x64xf32, #tpu.memory_space<vmem>>, vector<384x64xf32>
    %cst_52 = arith.constant dense<0.000000e+00> : vector<32x64xf32>
    %79 = tpu.matmul %77, %78, %cst_52 {dimension_numbers = #tpu.dot_dimension_numbers<[1], [0], [0], [1], [0, 0, 1, 1], [], []>} : vector<32x384xf32>, vector<384x64xf32>, vector<32x64xf32> -> vector<32x64xf32>
    %cst_53 = arith.constant dense<0.000000e+00> : vector<64xf32>
    %80 = vector.multi_reduction <add>, %79, %cst_53 [0] : vector<32x64xf32> to vector<64xf32>
    %81 = vector.shape_cast %80 : vector<64xf32> to vector<1x64xf32>
    %c0_54 = arith.constant 0 : index
    %c0_55 = arith.constant 0 : index
    %82 = vector.load %arg4[%c0_54, %c0_55] : memref<64x4xf32, #tpu.memory_space<vmem>>, vector<64x4xf32>
    %cst_56 = arith.constant dense<0.000000e+00> : vector<1x4xf32>
    %83 = tpu.matmul %81, %82, %cst_56 {dimension_numbers = #tpu.dot_dimension_numbers<[1], [0], [0], [1], [0, 0, 1, 1], [], []>} : vector<1x64xf32>, vector<64x4xf32>, vector<1x4xf32> -> vector<1x4xf32>
    %84 = arith.mulf %79, %79 : vector<32x64xf32>
    %cst_57 = arith.constant dense<0.000000e+00> : vector<64xf32>
    %85 = vector.multi_reduction <add>, %84, %cst_57 [0] : vector<32x64xf32> to vector<64xf32>
    %86 = vector.shape_cast %85 : vector<64xf32> to vector<1x64xf32>
    %c0_58 = arith.constant 0 : index
    %c0_59 = arith.constant 0 : index
    %87 = vector.load %arg4[%c0_58, %c0_59] : memref<64x4xf32, #tpu.memory_space<vmem>>, vector<64x4xf32>
    %cst_60 = arith.constant dense<0.000000e+00> : vector<1x4xf32>
    %88 = tpu.matmul %86, %87, %cst_60 {dimension_numbers = #tpu.dot_dimension_numbers<[1], [0], [0], [1], [0, 0, 1, 1], [], []>} : vector<1x64xf32>, vector<64x4xf32>, vector<1x4xf32> -> vector<1x4xf32>
    %cst_61 = arith.constant 0.001953125 : f32
    %89 = vector.broadcast %cst_61 : f32 to vector<1x4xf32>
    %90 = arith.mulf %83, %89 : vector<1x4xf32>
    %cst_62 = arith.constant 0.001953125 : f32
    %91 = vector.broadcast %cst_62 : f32 to vector<1x4xf32>
    %92 = arith.mulf %88, %91 : vector<1x4xf32>
    %93 = arith.mulf %90, %90 : vector<1x4xf32>
    %94 = arith.subf %92, %93 : vector<1x4xf32>
    %c0_63 = arith.constant 0 : index
    %c0_64 = arith.constant 0 : index
    %95 = vector.load %arg10[%c0_63, %c0_64] : memref<1x4xf32, #tpu.memory_space<vmem>>, vector<1x4xf32>
    %cst_65 = arith.constant 9.99999974E-6 : f32
    %96 = vector.broadcast %cst_65 : f32 to vector<1x4xf32>
    %97 = arith.addf %94, %96 : vector<1x4xf32>
    %98 = math.rsqrt %97 : vector<1x4xf32>
    %99 = arith.mulf %95, %98 : vector<1x4xf32>
    %c0_66 = arith.constant 0 : index
    %c0_67 = arith.constant 0 : index
    %100 = vector.load %arg11[%c0_66, %c0_67] : memref<1x4xf32, #tpu.memory_space<vmem>>, vector<1x4xf32>
    %101 = arith.mulf %90, %99 : vector<1x4xf32>
    %102 = arith.subf %100, %101 : vector<1x4xf32>
    %c0_68 = arith.constant 0 : index
    %c0_69 = arith.constant 0 : index
    %103 = vector.load %arg5[%c0_68, %c0_69] : memref<4x64xf32, #tpu.memory_space<vmem>>, vector<4x64xf32>
    %cst_70 = arith.constant dense<0.000000e+00> : vector<1x64xf32>
    %104 = tpu.matmul %99, %103, %cst_70 {dimension_numbers = #tpu.dot_dimension_numbers<[1], [0], [0], [1], [0, 0, 1, 1], [], []>} : vector<1x4xf32>, vector<4x64xf32>, vector<1x64xf32> -> vector<1x64xf32>
    %c0_71 = arith.constant 0 : index
    %c0_72 = arith.constant 0 : index
    %105 = vector.load %arg5[%c0_71, %c0_72] : memref<4x64xf32, #tpu.memory_space<vmem>>, vector<4x64xf32>
    %cst_73 = arith.constant dense<0.000000e+00> : vector<1x64xf32>
    %106 = tpu.matmul %102, %105, %cst_73 {dimension_numbers = #tpu.dot_dimension_numbers<[1], [0], [0], [1], [0, 0, 1, 1], [], []>} : vector<1x4xf32>, vector<4x64xf32>, vector<1x64xf32> -> vector<1x64xf32>
    %107 = vector.broadcast %104 : vector<1x64xf32> to vector<32x64xf32>
    %108 = arith.mulf %79, %107 : vector<32x64xf32>
    %109 = vector.broadcast %106 : vector<1x64xf32> to vector<32x64xf32>
    %110 = arith.addf %108, %109 : vector<32x64xf32>
    %cst_74 = arith.constant 0.000000e+00 : f32
    %111 = vector.broadcast %cst_74 : f32 to vector<32x64xf32>
    %112 = arith.maximumf %110, %111 : vector<32x64xf32>
    %c0_75 = arith.constant 0 : index
    %c0_76 = arith.constant 0 : index
    %113 = vector.load %arg3[%c0_75, %c0_76] : memref<64x256xf32, #tpu.memory_space<vmem>>, vector<64x256xf32>
    %cst_77 = arith.constant dense<0.000000e+00> : vector<32x256xf32>
    %114 = tpu.matmul %112, %113, %cst_77 {dimension_numbers = #tpu.dot_dimension_numbers<[1], [0], [0], [1], [0, 0, 1, 1], [], []>} : vector<32x64xf32>, vector<64x256xf32>, vector<32x256xf32> -> vector<32x256xf32>
    %cst_78 = arith.constant dense<0.000000e+00> : vector<256xf32>
    %115 = vector.multi_reduction <add>, %114, %cst_78 [0] : vector<32x256xf32> to vector<256xf32>
    %116 = vector.shape_cast %115 : vector<256xf32> to vector<1x256xf32>
    %c0_79 = arith.constant 0 : index
    %c0_80 = arith.constant 0 : index
    %117 = vector.load %arg6[%c0_79, %c0_80] : memref<256x16xf32, #tpu.memory_space<vmem>>, vector<256x16xf32>
    %cst_81 = arith.constant dense<0.000000e+00> : vector<1x16xf32>
    %118 = tpu.matmul %116, %117, %cst_81 {dimension_numbers = #tpu.dot_dimension_numbers<[1], [0], [0], [1], [0, 0, 1, 1], [], []>} : vector<1x256xf32>, vector<256x16xf32>, vector<1x16xf32> -> vector<1x16xf32>
    %119 = arith.mulf %114, %114 : vector<32x256xf32>
    %cst_82 = arith.constant dense<0.000000e+00> : vector<256xf32>
    %120 = vector.multi_reduction <add>, %119, %cst_82 [0] : vector<32x256xf32> to vector<256xf32>
    %121 = vector.shape_cast %120 : vector<256xf32> to vector<1x256xf32>
    %c0_83 = arith.constant 0 : index
    %c0_84 = arith.constant 0 : index
    %122 = vector.load %arg6[%c0_83, %c0_84] : memref<256x16xf32, #tpu.memory_space<vmem>>, vector<256x16xf32>
    %cst_85 = arith.constant dense<0.000000e+00> : vector<1x16xf32>
    %123 = tpu.matmul %121, %122, %cst_85 {dimension_numbers = #tpu.dot_dimension_numbers<[1], [0], [0], [1], [0, 0, 1, 1], [], []>} : vector<1x256xf32>, vector<256x16xf32>, vector<1x16xf32> -> vector<1x16xf32>
    %cst_86 = arith.constant 0.001953125 : f32
    %124 = vector.broadcast %cst_86 : f32 to vector<1x16xf32>
    %125 = arith.mulf %118, %124 : vector<1x16xf32>
    %cst_87 = arith.constant 0.001953125 : f32
    %126 = vector.broadcast %cst_87 : f32 to vector<1x16xf32>
    %127 = arith.mulf %123, %126 : vector<1x16xf32>
    %128 = arith.mulf %125, %125 : vector<1x16xf32>
    %129 = arith.subf %127, %128 : vector<1x16xf32>
    %c0_88 = arith.constant 0 : index
    %c0_89 = arith.constant 0 : index
    %130 = vector.load %arg12[%c0_88, %c0_89] : memref<1x16xf32, #tpu.memory_space<vmem>>, vector<1x16xf32>
    %cst_90 = arith.constant 9.99999974E-6 : f32
    %131 = vector.broadcast %cst_90 : f32 to vector<1x16xf32>
    %132 = arith.addf %129, %131 : vector<1x16xf32>
    %133 = math.rsqrt %132 : vector<1x16xf32>
    %134 = arith.mulf %130, %133 : vector<1x16xf32>
    %c0_91 = arith.constant 0 : index
    %c0_92 = arith.constant 0 : index
    %135 = vector.load %arg13[%c0_91, %c0_92] : memref<1x16xf32, #tpu.memory_space<vmem>>, vector<1x16xf32>
    %136 = arith.mulf %125, %134 : vector<1x16xf32>
    %137 = arith.subf %135, %136 : vector<1x16xf32>
    %c0_93 = arith.constant 0 : index
    %c0_94 = arith.constant 0 : index
    %138 = vector.load %arg7[%c0_93, %c0_94] : memref<16x256xf32, #tpu.memory_space<vmem>>, vector<16x256xf32>
    %cst_95 = arith.constant dense<0.000000e+00> : vector<1x256xf32>
    %139 = tpu.matmul %134, %138, %cst_95 {dimension_numbers = #tpu.dot_dimension_numbers<[1], [0], [0], [1], [0, 0, 1, 1], [], []>} : vector<1x16xf32>, vector<16x256xf32>, vector<1x256xf32> -> vector<1x256xf32>
    %c0_96 = arith.constant 0 : index
    %c0_97 = arith.constant 0 : index
    %140 = vector.load %arg7[%c0_96, %c0_97] : memref<16x256xf32, #tpu.memory_space<vmem>>, vector<16x256xf32>
    %cst_98 = arith.constant dense<0.000000e+00> : vector<1x256xf32>
    %141 = tpu.matmul %137, %140, %cst_98 {dimension_numbers = #tpu.dot_dimension_numbers<[1], [0], [0], [1], [0, 0, 1, 1], [], []>} : vector<1x16xf32>, vector<16x256xf32>, vector<1x256xf32> -> vector<1x256xf32>
    %142 = vector.broadcast %139 : vector<1x256xf32> to vector<32x256xf32>
    %143 = arith.mulf %114, %142 : vector<32x256xf32>
    %144 = vector.broadcast %141 : vector<1x256xf32> to vector<32x256xf32>
    %145 = arith.addf %143, %144 : vector<32x256xf32>
    %146 = arith.addf %145, %0 : vector<32x256xf32>
    %cst_99 = arith.constant 0.000000e+00 : f32
    %147 = vector.broadcast %cst_99 : f32 to vector<32x256xf32>
    %148 = arith.maximumf %146, %147 : vector<32x256xf32>
    %c0_100 = arith.constant 0 : index
    %c0_101 = arith.constant 0 : index
    %149 = vector.load %arg14[%c0_100, %c0_101] : memref<32x256xf32, #tpu.memory_space<vmem>>, vector<32x256xf32>
    tpu.vector_store %arg14[%c0_100, %c0_101], %148 {strides = array<i32>} : memref<32x256xf32, #tpu.memory_space<vmem>>, vector<32x256xf32>,
    return
  }
}

</mosaic_0001>

<bundles_post_ra>
// kernel: tile.19
= control target key start
LH: loop header
LB: loop body
LE: loop exit
PB: predicated region body
PF: predicated region fallthrough
CT: control target
= control target key end

     0   :  { %vm65_vm0 = vcmask 1043458   ;;  %s105_s6 = smov 3  ;;  %vm70_vm1 = vcmask 1045508   ;;  %vm75_vm2 = vcmask 1047558   ;;  %s108_s9 = smov 12  ;;  %vm4_vm3 = vcmask 1047556   ;;  %s1498_s0 = inlined_call_operand.vmem [shape: f32[16,16,16], index: 0, kind: input, shape index: {}]   ;;  %s1499_s1 = inlined_call_operand.vmem [shape: f32[256,16], index: 1, kind: output, shape index: {}]  }
   0x1   :  { %v726_v0 = vld [vmem:[%s1498_s0 + $0x87] ss:$16 sm:%s105_s6]   ;;  %s113_s10 = smov 48  ;;  %s118_s15 = smov 192  ;;  %vm6_vm4 = vcmask 130048   ;;  %vm79_vm5 = vcmask 1048448  }
   0x2   :  { %v727_v1 = vld [vmem:[%s1498_s0 + $0x87] ss:$16 sm:%s108_s9]   ;;  %s60_s16 = smov 3  ;;  %s63_s21 = smov 12  ;;  %vm170_vm6 = vcmask 917248   ;;  %vm261_vm7 = vcmask 786048  }
   0x3   :  { %v728_v2 = vld [vmem:[%s1498_s0 + $0x87] ss:$16 sm:%s113_s10]   ;;  %v111_v3 = vsel %vm65_vm0, %v727_v1, %v726_v0  ;;  %s68_s22 = smov 48  ;;  %s73_s27 = smov 192  ;;  %vm352_vm8 = vcmask 654848   ;;  %vm443_vm9 = vcmask 523648  }
   0x4   :  { %v729_v4 = vld [vmem:[%s1498_s0 + $0x87] ss:$16 sm:%s118_s15]   ;;  %v116_v6 = vsel %vm70_vm1, %v728_v2, %v111_v3  ;;  %s128_s28 = smov 3  ;;  %s131_s4 = smov 12  ;;  %vm534_vm10 = vcmask 392448   ;;  %vm625_vm11 = vcmask 261248  }
   0x5   :  { %v717_v5 = vld [vmem:[%s1498_s0 + $0x7] ss:$16 sm:%s60_s16]   ;;  %v121_v9 = vsel %vm75_vm2, %v729_v4, %v116_v6  ;;  %v731_v12 = vld [vmem:[%s1498_s0 + $0x8f] ss:$16 sm:%s128_s28]   ;;  %s136_s5 = smov 48  ;;  %s857_s6 = smov 112  }
   0x6   :  { %v718_v7 = vld [vmem:[%s1498_s0 + $0x7] ss:$16 sm:%s63_s21]   ;;  %122 = vrot.lane.b32.xlu1 %v121_v9, %s857_s6  ;;  %s141_s9 = smov 192  ;;  %s82_s10 = smov 3 }
   0x7   :  { %v719_v8 = vld [vmem:[%s1498_s0 + $0x7] ss:$16 sm:%s68_s22]   ;;  %v66_v10 = vsel %vm65_vm0, %v718_v7, %v717_v5  ;;  %v732_v14 = vld [vmem:[%s1498_s0 + $0x8f] ss:$16 sm:%s131_s4]   ;;  %s85_s15 = smov 12  ;;  %s90_s16 = smov 48 }
   0x8   :  { %v720_v11 = vld [vmem:[%s1498_s0 + $0x7] ss:$16 sm:%s73_s27]   ;;  %v71_v13 = vsel %vm70_vm1, %v719_v8, %v66_v10  ;;  %v134_v16 = vsel %vm65_vm0, %v732_v14, %v731_v12  ;;  %v733_v17 = vld [vmem:[%s1498_s0 + $0x8f] ss:$16 sm:%s136_s5]   ;;  %s95_s19 = smov 192  ;;  %s173_s24 = smov 3 }
   0x9   :  { %v76_v15 = vsel %vm75_vm2, %v720_v11, %v71_v13  ;;  %v734_v18 = vld [vmem:[%s1498_s0 + $0x8f] ss:$16 sm:%s141_s9]   ;;  %v139_v19 = vsel %vm70_vm1, %v733_v17, %v134_v16  ;;  %s176_s25 = smov 12  ;;  %s181_s28 = smov 48  ;;  %v740_v27 = vld [vmem:[%s1498_s0 + $0xe] ss:$16 sm:%s173_s24]  }
   0xa   :  { %77 = vrot.lane.b32.xlu0 %v76_v15, %s857_s6  ;;  %v721_v20 = vld [vmem:[%s1498_s0 + $0xf] ss:$16 sm:%s82_s10]   ;;  %v144_v21 = vsel %vm75_vm2, %v734_v18, %v139_v19  ;;  %s186_s29 = smov 192  ;;  %s151_s5 = smov 3 }
   0xb   :  { %v722_v22 = vld [vmem:[%s1498_s0 + $0xf] ss:$16 sm:%s85_s15]   ;;  %145 = vrot.lane.b32.xlu1 %v144_v21, %s857_s6  ;;  %s154_s7 = smov 12  ;;  %s159_s12 = smov 48 }
   0xc   :  { %v723_v23 = vld [vmem:[%s1498_s0 + $0xf] ss:$16 sm:%s90_s16]   ;;  %v88_v24 = vsel %vm65_vm0, %v722_v22, %v721_v20  ;;  %v741_v28 = vld [vmem:[%s1498_s0 + $0xe] ss:$16 sm:%s176_s25]   ;;  %s164_s13 = smov 192  ;;  %s219_s15 = smov 3 }
   0xd   :  { %v724_v25 = vld [vmem:[%s1498_s0 + $0xf] ss:$16 sm:%s95_s19]   ;;  %v93_v26 = vsel %vm70_vm1, %v723_v23, %v88_v24  ;;  %v179_v30 = vsel %vm65_vm0, %v741_v28, %v740_v27  ;;  %v742_v31 = vld [vmem:[%s1498_s0 + $0xe] ss:$16 sm:%s181_s28]   ;;  %s222_s16 = smov 12  ;;  %s227_s21 = smov 48 }
   0xe   :  { %v98_v29 = vsel %vm75_vm2, %v724_v25, %v93_v26  ;;  %v743_v32 = vld [vmem:[%s1498_s0 + $0xe] ss:$16 sm:%s186_s29]   ;;  %v184_v33 = vsel %vm70_vm1, %v742_v31, %v179_v30  ;;  %v736_v34 = vld [vmem:[%s1498_s0 + $0x6] ss:$16 sm:%s151_s5]   ;;  %s232_s22 = smov 192  ;;  %s858_s23 = smov 96  }
   0xf   :  { %99 = vrot.lane.b32.xlu0 %v98_v29, %s857_s6  ;;  %v189_v35 = vsel %vm75_vm2, %v743_v32, %v184_v33  ;;  %v737_v36 = vld [vmem:[%s1498_s0 + $0x6] ss:$16 sm:%s154_s7]   ;;  %s196_s26 = smov 3  ;;  %s199_s2 = smov 12 }
  0x10   :  { %v738_v37 = vld [vmem:[%s1498_s0 + $0x6] ss:$16 sm:%s159_s12]   ;;  %190 = vrot.lane.b32.xlu1 %v189_v35, %s858_s23  ;;  %v157_v38 = vsel %vm65_vm0, %v737_v36, %v736_v34  ;;  %s204_s3 = smov 48  ;;  %s209_s9 = smov 192 }
  0x11   :  { %v739_v39 = vld [vmem:[%s1498_s0 + $0x6] ss:$16 sm:%s164_s13]   ;;  %v162_v40 = vsel %vm70_vm1, %v738_v37, %v157_v38  ;;  %v750_v41 = vld [vmem:[%s1498_s0 + $0x8e] ss:$16 sm:%s219_s15]   ;;  %s264_s12 = smov 3  ;;  %s267_s13 = smov 12 }
  0x12   :  { %v751_v42 = vld [vmem:[%s1498_s0 + $0x8e] ss:$16 sm:%s222_s16]   ;;  %v167_v43 = vsel %vm75_vm2, %v739_v39, %v162_v40  ;;  %v745_v48 = vld [vmem:[%s1498_s0 + $0x86] ss:$16 sm:%s196_s26]   ;;  %s272_s17 = smov 48  ;;  %s277_s18 = smov 192 }
  0x13   :  { %v225_v44 = vsel %vm65_vm0, %v751_v42, %v750_v41  ;;  %v752_v45 = vld [vmem:[%s1498_s0 + $0x8e] ss:$16 sm:%s227_s21]   ;;  %168 = vrot.lane.b32.xlu0 %v167_v43, %s858_s23  ;;  %s242_s21 = smov 3  ;;  %s245_s27 = smov 12 }
  0x14   :  { %v753_v46 = vld [vmem:[%s1498_s0 + $0x8e] ss:$16 sm:%s232_s22]   ;;  %v230_v47 = vsel %vm70_vm1, %v752_v45, %v225_v44  ;;  %v746_v50 = vld [vmem:[%s1498_s0 + $0x86] ss:$16 sm:%s199_s2]   ;;  %s250_s28 = smov 48  ;;  %s255_s4 = smov 192 }
  0x15   :  { %v235_v49 = vsel %vm75_vm2, %v753_v46, %v230_v47  ;;  %v747_v51 = vld [vmem:[%s1498_s0 + $0x86] ss:$16 sm:%s204_s3]   ;;  %v202_v52 = vsel %vm65_vm0, %v746_v50, %v745_v48  ;;  %v759_v55 = vld [vmem:[%s1498_s0 + $0xd] ss:$16 sm:%s264_s12]   ;;  %s310_s7 = smov 3  ;;  %s313_s8 = smov 12 }
  0x16   :  { %236 = vrot.lane.b32.xlu1 %v235_v49, %s858_s23  ;;  %v748_v53 = vld [vmem:[%s1498_s0 + $0x86] ss:$16 sm:%s209_s9]   ;;  %v207_v54 = vsel %vm70_vm1, %v747_v51, %v202_v52  ;;  %s323_s6 = smov 192  ;;  %s859_s14 = smov 80  }
  0x17   :  { %v760_v56 = vld [vmem:[%s1498_s0 + $0xd] ss:$16 sm:%s267_s13]   ;;  %v212_v57 = vsel %vm75_vm2, %v748_v53, %v207_v54  ;;  %v755_v62 = vld [vmem:[%s1498_s0 + $0x5] ss:$16 sm:%s242_s21]   ;;  %s318_s13 = smov 48  ;;  %s290_s22 = smov 12 }
  0x18   :  { %v270_v58 = vsel %vm65_vm0, %v760_v56, %v759_v55  ;;  %v761_v59 = vld [vmem:[%s1498_s0 + $0xd] ss:$16 sm:%s272_s17]   ;;  %213 = vrot.lane.b32.xlu0 %v212_v57, %s858_s23  ;;  %s287_s17 = smov 3  ;;  %s295_s24 = smov 48 }
  0x19   :  { %v762_v60 = vld [vmem:[%s1498_s0 + $0xd] ss:$16 sm:%s277_s18]   ;;  %v275_v61 = vsel %vm70_vm1, %v761_v59, %v270_v58  ;;  %v756_v0 = vld [vmem:[%s1498_s0 + $0x5] ss:$16 sm:%s245_s27]   ;;  %s300_s29 = smov 192  ;;  %s355_s3 = smov 3 }
  0x1a   :  { %v280_v63 = vsel %vm75_vm2, %v762_v60, %v275_v61  ;;  %v757_v1 = vld [vmem:[%s1498_s0 + $0x5] ss:$16 sm:%s250_s28]   ;;  %v248_v2 = vsel %vm65_vm0, %v756_v0, %v755_v62  ;;  %v769_v5 = vld [vmem:[%s1498_s0 + $0x8d] ss:$16 sm:%s310_s7]   ;;  %s363_s9 = smov 48  ;;  %s368_s10 = smov 192 }
  0x1b   :  { %281 = vrot.lane.b32.xlu1 %v280_v63, %s859_s14  ;;  %v758_v3 = vld [vmem:[%s1498_s0 + $0x5] ss:$16 sm:%s255_s4]   ;;  %v253_v4 = vsel %vm70_vm1, %v757_v1, %v248_v2  ;;  %s358_s4 = smov 12  ;;  %s336_s18 = smov 12 }
  0x1c   :  { %v770_v6 = vld [vmem:[%s1498_s0 + $0x8d] ss:$16 sm:%s313_s8]   ;;  %v258_v7 = vsel %vm75_vm2, %v758_v3, %v253_v4  ;;  %v764_v12 = vld [vmem:[%s1498_s0 + $0x85] ss:$16 sm:%s287_s17]   ;;  %s341_s19 = smov 48  ;;  %s346_s25 = smov 192 }
  0x1d   :  { %v316_v8 = vsel %vm65_vm0, %v770_v6, %v769_v5  ;;  %v771_v9 = vld [vmem:[%s1498_s0 + $0x8d] ss:$16 sm:%s318_s13]   ;;  %259 = vrot.lane.b32.xlu0 %v258_v7, %s859_s14  ;;  %s333_s13 = smov 3  ;;  %s401_s27 = smov 3 }
  0x1e   :  { %v772_v10 = vld [vmem:[%s1498_s0 + $0x8d] ss:$16 sm:%s323_s6]   ;;  %v321_v11 = vsel %vm70_vm1, %v771_v9, %v316_v8  ;;  %v765_v14 = vld [vmem:[%s1498_s0 + $0x85] ss:$16 sm:%s290_s22]   ;;  %s404_s28 = smov 12  ;;  %s414_s23 = smov 192 }
  0x1f   :  { %v326_v13 = vsel %vm75_vm2, %v772_v10, %v321_v11  ;;  %v766_v15 = vld [vmem:[%s1498_s0 + $0x85] ss:$16 sm:%s295_s24]   ;;  %v293_v16 = vsel %vm65_vm0, %v765_v14, %v764_v12  ;;  %v778_v19 = vld [vmem:[%s1498_s0 + $0xc] ss:$16 sm:%s355_s3]   ;;  %s860_s5 = smov 64   ;;  %s381_s6 = smov 12 }
  0x20   :  { %327 = vrot.lane.b32.xlu1 %v326_v13, %s859_s14  ;;  %v767_v17 = vld [vmem:[%s1498_s0 + $0x85] ss:$16 sm:%s300_s29]   ;;  %v298_v18 = vsel %vm70_vm1, %v766_v15, %v293_v16  ;;  %s386_s15 = smov 48  ;;  %s391_s20 = smov 192 }
  0x21   :  { %v779_v20 = vld [vmem:[%s1498_s0 + $0xc] ss:$16 sm:%s358_s4]   ;;  %v303_v21 = vsel %vm75_vm2, %v767_v17, %v298_v18  ;;  %v774_v26 = vld [vmem:[%s1498_s0 + $0x4] ss:$16 sm:%s333_s13]   ;;  %s409_s4 = smov 48  ;;  %s446_s24 = smov 3 }
  0x22   :  { %v361_v22 = vsel %vm65_vm0, %v779_v20, %v778_v19  ;;  %v780_v23 = vld [vmem:[%s1498_s0 + $0xc] ss:$16 sm:%s363_s9]   ;;  %304 = vrot.lane.b32.xlu0 %v303_v21, %s859_s14  ;;  %s378_s9 = smov 3  ;;  %s454_s29 = smov 48 }
  0x23   :  { %v781_v24 = vld [vmem:[%s1498_s0 + $0xc] ss:$16 sm:%s368_s10]   ;;  %v366_v25 = vsel %vm70_vm1, %v780_v23, %v361_v22  ;;  %v775_v28 = vld [vmem:[%s1498_s0 + $0x4] ss:$16 sm:%s336_s18]   ;;  %s459_s30 = smov 192  ;;  %s427_s10 = smov 12 }
  0x24   :  { %v371_v27 = vsel %vm75_vm2, %v781_v24, %v366_v25  ;;  %v776_v29 = vld [vmem:[%s1498_s0 + $0x4] ss:$16 sm:%s341_s19]   ;;  %v339_v30 = vsel %vm65_vm0, %v775_v28, %v774_v26  ;;  %v788_v33 = vld [vmem:[%s1498_s0 + $0x8c] ss:$16 sm:%s401_s27]   ;;  %s432_s11 = smov 48  ;;  %s437_s16 = smov 192 }
  0x25   :  { %372 = vrot.lane.b32.xlu1 %v371_v27, %s860_s5  ;;  %v777_v31 = vld [vmem:[%s1498_s0 + $0x4] ss:$16 sm:%s346_s25]   ;;  %v344_v32 = vsel %vm70_vm1, %v776_v29, %v339_v30  ;;  %s449_s25 = smov 12  ;;  %s492_s18 = smov 3 }
  0x26   :  { %v789_v34 = vld [vmem:[%s1498_s0 + $0x8c] ss:$16 sm:%s404_s28]   ;;  %v349_v35 = vsel %vm75_vm2, %v777_v31, %v344_v32  ;;  %v783_v40 = vld [vmem:[%s1498_s0 + $0x84] ss:$16 sm:%s378_s9]   ;;  %s495_s19 = smov 12  ;;  %s505_s14 = smov 192 }
  0x27   :  { %v407_v36 = vsel %vm65_vm0, %v789_v34, %v788_v33  ;;  %v790_v37 = vld [vmem:[%s1498_s0 + $0x8c] ss:$16 sm:%s409_s4]   ;;  %350 = vrot.lane.b32.xlu0 %v349_v35, %s860_s5  ;;  %s424_s4 = smov 3  ;;  %s861_s26 = smov 48  }
  0x28   :  { %v791_v38 = vld [vmem:[%s1498_s0 + $0x8c] ss:$16 sm:%s414_s23]   ;;  %v412_v39 = vsel %vm70_vm1, %v790_v37, %v407_v36  ;;  %v784_v42 = vld [vmem:[%s1498_s0 + $0x84] ss:$16 sm:%s381_s6]   ;;  %s472_s23 = smov 12  ;;  %s477_s7 = smov 48 }
  0x29   :  { %v417_v41 = vsel %vm75_vm2, %v791_v38, %v412_v39  ;;  %v785_v43 = vld [vmem:[%s1498_s0 + $0x84] ss:$16 sm:%s386_s15]   ;;  %v384_v44 = vsel %vm65_vm0, %v784_v42, %v783_v40  ;;  %v797_v47 = vld [vmem:[%s1498_s0 + $0xb] ss:$16 sm:%s446_s24]   ;;  %s482_s12 = smov 192  ;;  %s537_s15 = smov 3 }
  0x2a   :  { %418 = vrot.lane.b32.xlu1 %v417_v41, %s860_s5  ;;  %v786_v45 = vld [vmem:[%s1498_s0 + $0x84] ss:$16 sm:%s391_s20]   ;;  %v389_v46 = vsel %vm70_vm1, %v785_v43, %v384_v44  ;;  %s545_s20 = smov 48  ;;  %s550_s21 = smov 192 }
  0x2b   :  { %v798_v48 = vld [vmem:[%s1498_s0 + $0xb] ss:$16 sm:%s449_s25]   ;;  %v394_v49 = vsel %vm75_vm2, %v786_v45, %v389_v46  ;;  %v793_v54 = vld [vmem:[%s1498_s0 + $0x3] ss:$16 sm:%s424_s4]   ;;  %s500_s25 = smov 48  ;;  %s523_s2 = smov 48 }
  0x2c   :  { %v452_v50 = vsel %vm65_vm0, %v798_v48, %v797_v47  ;;  %v799_v51 = vld [vmem:[%s1498_s0 + $0xb] ss:$16 sm:%s454_s29]   ;;  %395 = vrot.lane.b32.xlu0 %v394_v49, %s860_s5  ;;  %s469_s29 = smov 3  ;;  %s528_s8 = smov 192 }
  0x2d   :  { %v800_v52 = vld [vmem:[%s1498_s0 + $0xb] ss:$16 sm:%s459_s30]   ;;  %v457_v53 = vsel %vm70_vm1, %v799_v51, %v452_v50  ;;  %v794_v56 = vld [vmem:[%s1498_s0 + $0x3] ss:$16 sm:%s427_s10]   ;;  %s518_s30 = smov 12  ;;  %s583_s10 = smov 3 }
  0x2e   :  { %v462_v55 = vsel %vm75_vm2, %v800_v52, %v457_v53  ;;  %v795_v57 = vld [vmem:[%s1498_s0 + $0x3] ss:$16 sm:%s432_s11]   ;;  %v430_v58 = vsel %vm65_vm0, %v794_v56, %v793_v54  ;;  %v807_v61 = vld [vmem:[%s1498_s0 + $0x8b] ss:$16 sm:%s492_s18]   ;;  %s586_s11 = smov 12  ;;  %s596_s5 = smov 192 }
  0x2f   :  { %463 = vrot.lane.b32.xlu1 %v462_v55, %s861_s26  ;;  %v796_v59 = vld [vmem:[%s1498_s0 + $0x3] ss:$16 sm:%s437_s16]   ;;  %v435_v60 = vsel %vm70_vm1, %v795_v57, %v430_v58  ;;  %s540_s16 = smov 12  ;;  %s862_s17 = smov 32  }
  0x30   :  { %v808_v62 = vld [vmem:[%s1498_s0 + $0x8b] ss:$16 sm:%s495_s19]   ;;  %v440_v63 = vsel %vm75_vm2, %v796_v59, %v435_v60  ;;  %v802_v4 = vld [vmem:[%s1498_s0 + $0x83] ss:$16 sm:%s469_s29]   ;;  %s568_s27 = smov 48  ;;  %s573_s3 = smov 192 }
  0x31   :  { %v498_v0 = vsel %vm65_vm0, %v808_v62, %v807_v61  ;;  %v809_v1 = vld [vmem:[%s1498_s0 + $0x8b] ss:$16 sm:%s500_s25]   ;;  %441 = vrot.lane.b32.xlu0 %v440_v63, %s861_s26  ;;  %s515_s25 = smov 3  ;;  %s641_s13 = smov 192 }
  0x32   :  { %v810_v2 = vld [vmem:[%s1498_s0 + $0x8b] ss:$16 sm:%s505_s14]   ;;  %v503_v3 = vsel %vm70_vm1, %v809_v1, %v498_v0  ;;  %v803_v6 = vld [vmem:[%s1498_s0 + $0x83] ss:$16 sm:%s472_s23]   ;;  %s563_s14 = smov 12  ;;  %s609_s24 = smov 12 }
  0x33   :  { %v508_v5 = vsel %vm75_vm2, %v810_v2, %v503_v3  ;;  %v804_v7 = vld [vmem:[%s1498_s0 + $0x83] ss:$16 sm:%s477_s7]   ;;  %v475_v8 = vsel %vm65_vm0, %v803_v6, %v802_v4  ;;  %v816_v11 = vld [vmem:[%s1498_s0 + $0xa] ss:$16 sm:%s537_s15]   ;;  %s628_s7 = smov 3  ;;  %s677_s4 = smov 12 }
  0x34   :  { %509 = vrot.lane.b32.xlu1 %v508_v5, %s861_s26  ;;  %v805_v9 = vld [vmem:[%s1498_s0 + $0x83] ss:$16 sm:%s482_s12]   ;;  %v480_v10 = vsel %vm70_vm1, %v804_v7, %v475_v8  ;;  %s636_s12 = smov 48  ;;  %v2_v38 = vld [vmem:[%s1498_s0] ss:$8 sm:$0xf]  }
  0x35   :  { %v817_v12 = vld [vmem:[%s1498_s0 + $0xa] ss:$16 sm:%s540_s16]   ;;  %v485_v13 = vsel %vm75_vm2, %v805_v9, %v480_v10  ;;  %v812_v18 = vld [vmem:[%s1498_s0 + $0x2] ss:$16 sm:%s515_s25]   ;;  %s591_s16 = smov 48  ;;  %s614_s25 = smov 48 }
  0x36   :  { %v543_v14 = vsel %vm65_vm0, %v817_v12, %v816_v11  ;;  %v818_v15 = vld [vmem:[%s1498_s0 + $0xa] ss:$16 sm:%s545_s20]   ;;  %486 = vrot.lane.b32.xlu0 %v485_v13, %s861_s26  ;;  %s560_s20 = smov 3  ;;  %v3_v48 = vld [vmem:[%s1498_s0] ss:$8 sm:$0xf0]  }
  0x37   :  { %v819_v16 = vld [vmem:[%s1498_s0 + $0xa] ss:$16 sm:%s550_s21]   ;;  %v548_v17 = vsel %vm70_vm1, %v818_v15, %v543_v14  ;;  %v813_v20 = vld [vmem:[%s1498_s0 + $0x2] ss:$16 sm:%s518_s30]   ;;  %s619_s30 = smov 192  ;;  %v5_v52 = vsel %vm4_vm3, %v3_v48, %v2_v38  ;;  %s664_s26 = smov 192 }
  0x38   :  { %v553_v19 = vsel %vm75_vm2, %v819_v16, %v548_v17  ;;  %v814_v21 = vld [vmem:[%s1498_s0 + $0x2] ss:$16 sm:%s523_s2]   ;;  %v521_v22 = vsel %vm65_vm0, %v813_v20, %v812_v18  ;;  %v826_v25 = vld [vmem:[%s1498_s0 + $0x8a] ss:$16 sm:%s583_s10]   ;;  %s674_s2 = smov 3 }
  0x39   :  { %554 = vrot.lane.b32.xlu1 %v553_v19, %s862_s17  ;;  %v815_v23 = vld [vmem:[%s1498_s0 + $0x2] ss:$16 sm:%s528_s8]   ;;  %v526_v24 = vsel %vm70_vm1, %v814_v21, %v521_v22  ;;  %s631_s8 = smov 12  ;;  %7 = vst.msk [vmem:[%s1499_s1] ss:$8 sm:$0x3] %vm6_vm4, %v5_v52  }
  0x3a   :  { %v827_v26 = vld [vmem:[%s1498_s0 + $0x8a] ss:$16 sm:%s586_s11]   ;;  %v531_v27 = vsel %vm75_vm2, %v815_v23, %v526_v24  ;;  %v821_v32 = vld [vmem:[%s1498_s0 + $0x82] ss:$16 sm:%s560_s20]   ;;  %s682_s11 = smov 48 }
  0x3b   :  { %v589_v28 = vsel %vm65_vm0, %v827_v26, %v826_v25  ;;  %v828_v29 = vld [vmem:[%s1498_s0 + $0x8a] ss:$16 sm:%s591_s16]   ;;  %532 = vrot.lane.b32.xlu0 %v531_v27, %s862_s17  ;;  %s606_s16 = smov 3  ;;  %696 = vst.msk [vmem:[%s1499_s1 - $0xf] ss:$8 sm:$0xc] %vm6_vm4, %v5_v52  }
  0x3c   :  { %v829_v30 = vld [vmem:[%s1498_s0 + $0x8a] ss:$16 sm:%s596_s5]   ;;  %v594_v31 = vsel %vm70_vm1, %v828_v29, %v589_v28  ;;  %v822_v34 = vld [vmem:[%s1498_s0 + $0x82] ss:$16 sm:%s563_s14]  }
  0x3d   :  { %v599_v33 = vsel %vm75_vm2, %v829_v30, %v594_v31  ;;  %v823_v35 = vld [vmem:[%s1498_s0 + $0x82] ss:$16 sm:%s568_s27]   ;;  %v566_v36 = vsel %vm65_vm0, %v822_v34, %v821_v32  ;;  %v835_v40 = vld [vmem:[%s1498_s0 + $0x9] ss:$16 sm:%s628_s7]  }
  0x3e   :  { %600 = vrot.lane.b32.xlu1 %v599_v33, %s862_s17  ;;  %v824_v37 = vld [vmem:[%s1498_s0 + $0x82] ss:$16 sm:%s573_s3]   ;;  %v571_v39 = vsel %vm70_vm1, %v823_v35, %v566_v36  ;;  %697 = vst.msk [vmem:[%s1499_s1 - $0x1e] ss:$8 sm:$0x30] %vm6_vm4, %v5_v52   ;;  %s659_s3 = smov 48 }
  0x3f   :  { %v836_v41 = vld [vmem:[%s1498_s0 + $0x9] ss:$16 sm:%s631_s8]   ;;  %v576_v42 = vsel %vm75_vm2, %v824_v37, %v571_v39  ;;  %v831_v47 = vld [vmem:[%s1498_s0 + $0x1] ss:$16 sm:%s606_s16]   ;;  %s651_s16 = smov 3 }
  0x40   :  { %v634_v43 = vsel %vm65_vm0, %v836_v41, %v835_v40  ;;  %v837_v44 = vld [vmem:[%s1498_s0 + $0x9] ss:$16 sm:%s636_s12]   ;;  %577 = vrot.lane.b32.xlu0 %v576_v42, %s862_s17  ;;  %s687_s12 = smov 192  ;;  %698 = vst.msk [vmem:[%s1499_s1 - $0x2d] ss:$8 sm:$0xc0] %vm6_vm4, %v5_v52  }
  0x41   :  { %v838_v45 = vld [vmem:[%s1498_s0 + $0x9] ss:$16 sm:%s641_s13]   ;;  %v639_v46 = vsel %vm70_vm1, %v837_v44, %v634_v43  ;;  %v832_v50 = vld [vmem:[%s1498_s0 + $0x1] ss:$16 sm:%s609_s24]   ;;  %s863_s13 = smov 16   ;;  %s654_s17 = smov 12 }
  0x42   :  { %v644_v49 = vsel %vm75_vm2, %v838_v45, %v639_v46  ;;  %v833_v51 = vld [vmem:[%s1498_s0 + $0x1] ss:$16 sm:%s614_s25]   ;;  %v612_v53 = vsel %vm65_vm0, %v832_v50, %v831_v47  ;;  %v699_v55 = vld [vmem:[%s1498_s0 + $0x40] ss:$8 sm:$0xf]  }
  0x43   :  { %645 = vrot.lane.b32.xlu1 %v644_v49, %s863_s13  ;;  %v834_v54 = vld [vmem:[%s1498_s0 + $0x1] ss:$16 sm:%s619_s30]   ;;  %v617_v56 = vsel %vm70_vm1, %v833_v51, %v612_v53  ;;  %v700_v1 = vld [vmem:[%s1498_s0 + $0x40] ss:$8 sm:$0xf0]  }
  0x44   :  { %v845_v57 = vld [vmem:[%s1498_s0 + $0x89] ss:$16 sm:%s674_s2]   ;;  %v622_v59 = vsel %vm75_vm2, %v834_v54, %v617_v56  ;;  %v840_v0 = vld [vmem:[%s1498_s0 + $0x81] ss:$16 sm:%s651_s16]   ;;  %v19_v5 = vsel %vm4_vm3, %v700_v1, %v699_v55 }
  0x45   :  { %v846_v58 = vld [vmem:[%s1498_s0 + $0x89] ss:$16 sm:%s677_s4]   ;;  %623 = vrot.lane.b32.xlu0 %v622_v59, %s863_s13  ;;  %701 = vst.msk [vmem:[%s1499_s1 + $0x4] ss:$8 sm:$0x3] %vm6_vm4, %v19_v5  }
  0x46   :  { %v680_v60 = vsel %vm65_vm0, %v846_v58, %v845_v57  ;;  %v847_v61 = vld [vmem:[%s1498_s0 + $0x89] ss:$16 sm:%s682_s11]   ;;  %v841_v3 = vld [vmem:[%s1498_s0 + $0x81] ss:$16 sm:%s654_s17]  }
  0x47   :  { %v848_v62 = vld [vmem:[%s1498_s0 + $0x89] ss:$16 sm:%s687_s12]   ;;  %v685_v63 = vsel %vm70_vm1, %v847_v61, %v680_v60  ;;  %v842_v4 = vld [vmem:[%s1498_s0 + $0x81] ss:$16 sm:%s659_s3]   ;;  %v657_v6 = vsel %vm65_vm0, %v841_v3, %v840_v0 }
  0x48   :  { %v690_v2 = vsel %vm75_vm2, %v848_v62, %v685_v63  ;;  %v843_v7 = vld [vmem:[%s1498_s0 + $0x81] ss:$16 sm:%s664_s26]   ;;  %702 = vst.msk [vmem:[%s1499_s1 - $0xb] ss:$8 sm:$0xc] %vm6_vm4, %v19_v5   ;;  %v662_v9 = vsel %vm70_vm1, %v842_v4, %v657_v6 }
  0x49   :  { %691 = vrot.lane.b32.xlu1 %v690_v2, %s863_s13  ;;  %703 = vst.msk [vmem:[%s1499_s1 - $0x1a] ss:$8 sm:$0x30] %vm6_vm4, %v19_v5   ;;  %704 = vst.msk [vmem:[%s1499_s1 - $0x29] ss:$8 sm:$0xc0] %vm6_vm4, %v19_v5   ;;  %v667_v12 = vsel %vm75_vm2, %v843_v7, %v662_v9 }
  0x4a   :  { %v705_v8 = vld [vmem:[%s1498_s0 + $0x80] ss:$8 sm:$0xf]   ;;  %668 = vrot.lane.b32.xlu0 %v667_v12, %s863_s13 }
  0x4b   :  { %v706_v10 = vld [vmem:[%s1498_s0 + $0x80] ss:$8 sm:$0xf0]  }
  0x4c   :  { %v711_v11 = vld [vmem:[%s1498_s0 + $0xc0] ss:$8 sm:$0xf]   ;;  %v34_v13 = vsel %vm4_vm3, %v706_v10, %v705_v8 }
  0x4d   :  { %v712_v14 = vld [vmem:[%s1498_s0 + $0xc0] ss:$8 sm:$0xf0]   ;;  %707 = vst.msk [vmem:[%s1499_s1 + $0x10] ss:$8 sm:$0x3] %vm6_vm4, %v34_v13  }
  0x4e   :  { %708 = vst.msk [vmem:[%s1499_s1 + $0x1] ss:$8 sm:$0xc] %vm6_vm4, %v34_v13   ;;  %709 = vst.msk [vmem:[%s1499_s1 - $0xe] ss:$8 sm:$0x30] %vm6_vm4, %v34_v13   ;;  %v49_v15 = vsel %vm4_vm3, %v712_v14, %v711_v11 }
  0x4f   :  { %710 = vst.msk [vmem:[%s1499_s1 - $0x1d] ss:$8 sm:$0xc0] %vm6_vm4, %v34_v13   ;;  %713 = vst.msk [vmem:[%s1499_s1 + $0x14] ss:$8 sm:$0x3] %vm6_vm4, %v49_v15  }
  0x50   :  { %714 = vst.msk [vmem:[%s1499_s1 + $0x5] ss:$8 sm:$0xc] %vm6_vm4, %v49_v15   ;;  %715 = vst.msk [vmem:[%s1499_s1 - $0xa] ss:$8 sm:$0x30] %vm6_vm4, %v49_v15  }
  0x51   :  { %716 = vst.msk [vmem:[%s1499_s1 - $0x19] ss:$8 sm:$0xc0] %vm6_vm4, %v49_v15  }
  0x78   :  { %v123_v16 = vpop.permute.xlu1 %122  }
  0x79   :  { %730 = vst.msk [vmem:[%s1499_s1 + $0x10] sm:$0xff] %vm79_vm5, %v123_v16  }
  0x7c   :  { %v78_v17 = vpop.permute.xlu0 %77  }
  0x7d   :  { %80 = vst.msk [vmem:[%s1499_s1] sm:$0xff] %vm79_vm5, %v78_v17   ;;  %v146_v18 = vpop.permute.xlu1 %145  }
  0x7e   :  { %735 = vst.msk [vmem:[%s1499_s1 + $0x18] sm:$0xff] %vm79_vm5, %v146_v18  }
  0x81   :  { %v100_v19 = vpop.permute.xlu0 %99  }
  0x82   :  { %725 = vst.msk [vmem:[%s1499_s1 + $0x8] sm:$0xff] %vm79_vm5, %v100_v19   ;;  %v191_v20 = vpop.permute.xlu1 %190  }
  0x83   :  { %744 = vst.msk [vmem:[%s1499_s1 + $0x8] sm:$0xff] %vm170_vm6, %v191_v20  }
  0x85   :  { %v169_v21 = vpop.permute.xlu0 %168  }
  0x86   :  { %171 = vst.msk [vmem:[%s1499_s1] sm:$0xff] %vm170_vm6, %v169_v21  }
  0x88   :  { %v237_v22 = vpop.permute.xlu1 %236  }
  0x89   :  { %754 = vst.msk [vmem:[%s1499_s1 + $0x18] sm:$0xff] %vm170_vm6, %v237_v22  }
  0x8a   :  { %v214_v23 = vpop.permute.xlu0 %213  }
  0x8b   :  { %749 = vst.msk [vmem:[%s1499_s1 + $0x10] sm:$0xff] %vm170_vm6, %v214_v23  }
  0x8d   :  { %v282_v24 = vpop.permute.xlu1 %281  }
  0x8e   :  { %763 = vst.msk [vmem:[%s1499_s1 + $0x8] sm:$0xff] %vm261_vm7, %v282_v24  }
  0x8f   :  { %v260_v25 = vpop.permute.xlu0 %259  }
  0x90   :  { %262 = vst.msk [vmem:[%s1499_s1] sm:$0xff] %vm261_vm7, %v260_v25  }
  0x92   :  { %v328_v26 = vpop.permute.xlu1 %327  }
  0x93   :  { %773 = vst.msk [vmem:[%s1499_s1 + $0x18] sm:$0xff] %vm261_vm7, %v328_v26  }
  0x94   :  { %v305_v27 = vpop.permute.xlu0 %304  }
  0x95   :  { %768 = vst.msk [vmem:[%s1499_s1 + $0x10] sm:$0xff] %vm261_vm7, %v305_v27  }
  0x97   :  { %v373_v28 = vpop.permute.xlu1 %372  }
  0x98   :  { %782 = vst.msk [vmem:[%s1499_s1 + $0x8] sm:$0xff] %vm352_vm8, %v373_v28  }
  0x99   :  { %v351_v29 = vpop.permute.xlu0 %350  }
  0x9a   :  { %353 = vst.msk [vmem:[%s1499_s1] sm:$0xff] %vm352_vm8, %v351_v29  }
  0x9c   :  { %v419_v30 = vpop.permute.xlu1 %418  }
  0x9d   :  { %792 = vst.msk [vmem:[%s1499_s1 + $0x18] sm:$0xff] %vm352_vm8, %v419_v30  }
  0x9e   :  { %v396_v31 = vpop.permute.xlu0 %395  }
  0x9f   :  { %787 = vst.msk [vmem:[%s1499_s1 + $0x10] sm:$0xff] %vm352_vm8, %v396_v31  }
  0xa1   :  { %v464_v32 = vpop.permute.xlu1 %463  }
  0xa2   :  { %801 = vst.msk [vmem:[%s1499_s1 + $0x8] sm:$0xff] %vm443_vm9, %v464_v32  }
  0xa3   :  { %v442_v33 = vpop.permute.xlu0 %441  }
  0xa4   :  { %444 = vst.msk [vmem:[%s1499_s1] sm:$0xff] %vm443_vm9, %v442_v33  }
  0xa6   :  { %v510_v34 = vpop.permute.xlu1 %509  }
  0xa7   :  { %811 = vst.msk [vmem:[%s1499_s1 + $0x18] sm:$0xff] %vm443_vm9, %v510_v34  }
  0xa8   :  { %v487_v35 = vpop.permute.xlu0 %486  }
  0xa9   :  { %806 = vst.msk [vmem:[%s1499_s1 + $0x10] sm:$0xff] %vm443_vm9, %v487_v35  }
  0xab   :  { %v555_v36 = vpop.permute.xlu1 %554  }
  0xac   :  { %820 = vst.msk [vmem:[%s1499_s1 + $0x8] sm:$0xff] %vm534_vm10, %v555_v36  }
  0xad   :  { %v533_v37 = vpop.permute.xlu0 %532  }
  0xae   :  { %535 = vst.msk [vmem:[%s1499_s1] sm:$0xff] %vm534_vm10, %v533_v37  }
  0xb0   :  { %v601_v38 = vpop.permute.xlu1 %600  }
  0xb1   :  { %830 = vst.msk [vmem:[%s1499_s1 + $0x18] sm:$0xff] %vm534_vm10, %v601_v38  }
  0xb2   :  { %v578_v39 = vpop.permute.xlu0 %577  }
  0xb3   :  { %825 = vst.msk [vmem:[%s1499_s1 + $0x10] sm:$0xff] %vm534_vm10, %v578_v39  }
  0xb5   :  { %v646_v40 = vpop.permute.xlu1 %645  }
  0xb6   :  { %839 = vst.msk [vmem:[%s1499_s1 + $0x8] sm:$0xff] %vm625_vm11, %v646_v40  }
  0xb7   :  { %v624_v41 = vpop.permute.xlu0 %623  }
  0xb8   :  { %626 = vst.msk [vmem:[%s1499_s1] sm:$0xff] %vm625_vm11, %v624_v41  }
  0xbb   :  { %v692_v42 = vpop.permute.xlu1 %691  }
  0xbc   :  { %849 = vst.msk [vmem:[%s1499_s1 + $0x18] sm:$0xff] %vm625_vm11, %v692_v42   ;;  %v669_v43 = vpop.permute.xlu0 %668  }
  0xbd   :  { %844 = vst.msk [vmem:[%s1499_s1 + $0x10] sm:$0xff] %vm625_vm11, %v669_v43  }

// kernel: tile.14
= control target key start
LH: loop header
LB: loop body
LE: loop exit
PB: predicated region body
PF: predicated region fallthrough
CT: control target
= control target key end

     0   :  { %vm6_vm0 = vcmask 1043458   ;;  %s11_s6 = smov 3  ;;  %s14_s7 = smov 12  ;;  %vm8_vm1 = vcmask 31744   ;;  %vm20_vm2 = vcmask 523744   ;;  %vm32_vm3 = vcmask 490944   ;;  %s381_s0 = inlined_call_operand.vmem [shape: f32[16,4,4], index: 0, kind: input, shape index: {}]   ;;  %s382_s1 = inlined_call_operand.vmem [shape: f32[64,4], index: 1, kind: output, shape index: {}]  }
   0x1   :  { %v196_v0 = vld [vmem:[%s381_s0 + $0xf] ss:$16 sm:%s11_s6]   ;;  %s35_s12 = smov 3  ;;  %s38_s15 = smov 12  ;;  %vm44_vm4 = vcmask 458144   ;;  %vm56_vm5 = vcmask 425344  }
   0x2   :  { %v197_v1 = vld [vmem:[%s381_s0 + $0xf] ss:$16 sm:%s14_s7]   ;;  %v200_v3 = vld [vmem:[%s381_s0 + $0xd] ss:$16 sm:%s35_s12]   ;;  %s241_s16 = smov 60   ;;  %s23_s19 = smov 3 }
   0x3   :  { %v17_v2 = vsel %vm6_vm0, %v197_v1, %v196_v0  ;;  %v201_v4 = vld [vmem:[%s381_s0 + $0xd] ss:$16 sm:%s38_s15]   ;;  %s26_s20 = smov 12  ;;  %v198_v6 = vld [vmem:[%s381_s0 + $0xe] ss:$16 sm:%s23_s19]   ;;  %s47_s25 = smov 3 }
   0x4   :  { %18 = vrot.lane.b32.xlu0 %v17_v2, %s241_s16  ;;  %v41_v5 = vsel %vm6_vm0, %v201_v4, %v200_v3  ;;  %v199_v7 = vld [vmem:[%s381_s0 + $0xe] ss:$16 sm:%s26_s20]   ;;  %s242_s26 = smov 52   ;;  %s50_s29 = smov 12  ;;  %vm68_vm6 = vcmask 392544   ;;  %vm80_vm7 = vcmask 359744  }
   0x5   :  { %42 = vrot.lane.b32.xlu1 %v41_v5, %s242_s26  ;;  %v29_v8 = vsel %vm6_vm0, %v199_v7, %v198_v6  ;;  %v202_v9 = vld [vmem:[%s381_s0 + $0xc] ss:$16 sm:%s47_s25]   ;;  %s59_s3 = smov 3  ;;  %s62_s4 = smov 12  ;;  %vm92_vm8 = vcmask 326944   ;;  %vm104_vm9 = vcmask 294144  }
   0x6   :  { %v203_v10 = vld [vmem:[%s381_s0 + $0xc] ss:$16 sm:%s50_s29]   ;;  %s243_s5 = smov 56   ;;  %v204_v12 = vld [vmem:[%s381_s0 + $0xb] ss:$16 sm:%s59_s3]   ;;  %s71_s8 = smov 3 }
   0x7   :  { %v53_v11 = vsel %vm6_vm0, %v203_v10, %v202_v9  ;;  %v205_v13 = vld [vmem:[%s381_s0 + $0xb] ss:$16 sm:%s62_s4]   ;;  %v206_v14 = vld [vmem:[%s381_s0 + $0xa] ss:$16 sm:%s71_s8]   ;;  %s74_s13 = smov 12  ;;  %s244_s14 = smov 48  }
   0x8   :  { %30 = vrot.lane.b32.xlu0 %v29_v8, %s243_s5  ;;  %v65_v15 = vsel %vm6_vm0, %v205_v13, %v204_v12  ;;  %v207_v16 = vld [vmem:[%s381_s0 + $0xa] ss:$16 sm:%s74_s13]   ;;  %s83_s17 = smov 3  ;;  %s86_s18 = smov 12  ;;  %vm116_vm10 = vcmask 261344   ;;  %vm128_vm11 = vcmask 228544  }
   0x9   :  { %54 = vrot.lane.b32.xlu1 %v53_v11, %s244_s14  ;;  %v77_v17 = vsel %vm6_vm0, %v207_v16, %v206_v14  ;;  %v208_v18 = vld [vmem:[%s381_s0 + $0x9] ss:$16 sm:%s83_s17]   ;;  %s95_s23 = smov 3  ;;  %s245_s24 = smov 44   ;;  %vm140_vm12 = vcmask 195744   ;;  %vm152_vm13 = vcmask 162944  }
   0xa   :  { %v209_v19 = vld [vmem:[%s381_s0 + $0x9] ss:$16 sm:%s86_s18]   ;;  %v210_v20 = vld [vmem:[%s381_s0 + $0x8] ss:$16 sm:%s95_s23]   ;;  %s98_s27 = smov 12  ;;  %s107_s30 = smov 3 }
   0xb   :  { %v89_v21 = vsel %vm6_vm0, %v209_v19, %v208_v18  ;;  %v211_v22 = vld [vmem:[%s381_s0 + $0x8] ss:$16 sm:%s98_s27]   ;;  %s110_s2 = smov 12  ;;  %s246_s3 = smov 40   ;;  %v212_v23 = vld [vmem:[%s381_s0 + $0x7] ss:$16 sm:%s107_s30]  }
   0xc   :  { %66 = vrot.lane.b32.xlu0 %v65_v15, %s245_s24  ;;  %s119_s6 = smov 3  ;;  %v101_v24 = vsel %vm6_vm0, %v211_v22, %v210_v20  ;;  %v213_v25 = vld [vmem:[%s381_s0 + $0x7] ss:$16 sm:%s110_s2]   ;;  %s122_s11 = smov 12  ;;  %vm164_vm14 = vcmask 130144   ;;  %vm176_vm15 = vcmask 97344  }
   0xd   :  { %78 = vrot.lane.b32.xlu1 %v77_v17, %s246_s3  ;;  %v214_v26 = vld [vmem:[%s381_s0 + $0x6] ss:$16 sm:%s119_s6]   ;;  %s247_s12 = smov 36   ;;  %s131_s15 = smov 3  ;;  %v113_v28 = vsel %vm6_vm0, %v213_v25, %v212_v23 }
   0xe   :  { %v215_v27 = vld [vmem:[%s381_s0 + $0x6] ss:$16 sm:%s122_s11]   ;;  %s134_s16 = smov 12  ;;  %v216_v29 = vld [vmem:[%s381_s0 + $0x5] ss:$16 sm:%s131_s15]   ;;  %s143_s19 = smov 3 }
   0xf   :  { %s248_s20 = smov 32   ;;  %v217_v30 = vld [vmem:[%s381_s0 + $0x5] ss:$16 sm:%s134_s16]   ;;  %s146_s23 = smov 12  ;;  %v125_v31 = vsel %vm6_vm0, %v215_v27, %v214_v26  ;;  %v218_v32 = vld [vmem:[%s381_s0 + $0x4] ss:$16 sm:%s143_s19]  }
  0x10   :  { %90 = vrot.lane.b32.xlu0 %v89_v21, %s247_s12  ;;  %s155_s26 = smov 3  ;;  %s158_s27 = smov 12  ;;  %v219_v33 = vld [vmem:[%s381_s0 + $0x4] ss:$16 sm:%s146_s23]   ;;  %v137_v34 = vsel %vm6_vm0, %v217_v30, %v216_v29 }
  0x11   :  { %102 = vrot.lane.b32.xlu1 %v101_v24, %s248_s20  ;;  %s249_s28 = smov 28   ;;  %s167_s2 = smov 3  ;;  %v220_v35 = vld [vmem:[%s381_s0 + $0x3] ss:$16 sm:%s155_s26]   ;;  %v149_v37 = vsel %vm6_vm0, %v219_v33, %v218_v32 }
  0x12   :  { %s170_s5 = smov 12  ;;  %s250_s6 = smov 24   ;;  %v221_v36 = vld [vmem:[%s381_s0 + $0x3] ss:$16 sm:%s158_s27]   ;;  %v222_v38 = vld [vmem:[%s381_s0 + $0x2] ss:$16 sm:%s167_s2]  }
  0x13   :  { %s179_s9 = smov 3  ;;  %v223_v39 = vld [vmem:[%s381_s0 + $0x2] ss:$16 sm:%s170_s5]   ;;  %s182_s14 = smov 12  ;;  %v161_v41 = vsel %vm6_vm0, %v221_v36, %v220_v35 }
  0x14   :  { %114 = vrot.lane.b32.xlu0 %v113_v28, %s249_s28  ;;  %s2_s15 = smov 3  ;;  %s251_s16 = smov 20   ;;  %v224_v42 = vld [vmem:[%s381_s0 + $0x1] ss:$16 sm:%s179_s9]   ;;  %v173_v46 = vsel %vm6_vm0, %v223_v39, %v222_v38 }
  0x15   :  { %126 = vrot.lane.b32.xlu1 %v125_v31, %s250_s6  ;;  %v3_v40 = vld [vmem:[%s381_s0] ss:$16 sm:%s2_s15]   ;;  %s4_s19 = smov 12  ;;  %s252_s24 = smov 16  }
  0x16   :  { %v5_v43 = vld [vmem:[%s381_s0] ss:$16 sm:%s4_s19]   ;;  %v225_v44 = vld [vmem:[%s381_s0 + $0x1] ss:$16 sm:%s182_s14]   ;;  %s253_s0 = smov 12   ;;  %s254_s27 = smov 8  }
  0x17   :  { %v7_v45 = vsel %vm6_vm0, %v5_v43, %v3_v40  ;;  %v185_v47 = vsel %vm6_vm0, %v225_v44, %v224_v42  ;;  %s255_s28 = smov 4   ;;  %vm188_vm0 = vcmask 64544  }
  0x18   :  { %138 = vrot.lane.b32.xlu0 %v137_v34, %s251_s16  ;;  %9 = vst.msk [vmem:[#allocation0] sm:$0xf] %vm8_vm1, %v7_v45  }
  0x19   :  { %150 = vrot.lane.b32.xlu1 %v149_v37, %s252_s24 }
  0x1c   :  { %162 = vrot.lane.b32.xlu0 %v161_v41, %s253_s0 }
  0x1d   :  { %174 = vrot.lane.b32.xlu1 %v173_v46, %s254_s27 }
  0x20   :  { %186 = vrot.lane.b32.xlu0 %v185_v47, %s255_s28 }
  0x76   :  { %v19_v48 = vpop.permute.xlu0 %18  }
  0x77   :  { %21 = vst.msk [vmem:[#allocation0] sm:$0xf] %vm20_vm2, %v19_v48   ;;  %v43_v49 = vpop.permute.xlu1 %42  }
  0x7a   :  { %v31_v50 = vpop.permute.xlu0 %30  }
  0x7b   :  { %33 = vst.msk [vmem:[#allocation0] sm:$0xf] %vm32_vm3, %v31_v50   ;;  %v55_v51 = vpop.permute.xlu1 %54  }
  0x7c   :  { %45 = vst.msk [vmem:[#allocation0] sm:$0xf] %vm44_vm4, %v43_v49  }
  0x7d   :  { %57 = vst.msk [vmem:[#allocation0] sm:$0xf] %vm56_vm5, %v55_v51  }
  0x7e   :  { %v67_v52 = vpop.permute.xlu0 %66  }
  0x7f   :  { %69 = vst.msk [vmem:[#allocation0] sm:$0xf] %vm68_vm6, %v67_v52   ;;  %v79_v53 = vpop.permute.xlu1 %78  }
  0x80   :  { %81 = vst.msk [vmem:[#allocation0] sm:$0xf] %vm80_vm7, %v79_v53  }
  0x82   :  { %v91_v54 = vpop.permute.xlu0 %90  }
  0x83   :  { %93 = vst.msk [vmem:[#allocation0] sm:$0xf] %vm92_vm8, %v91_v54   ;;  %v103_v55 = vpop.permute.xlu1 %102  }
  0x84   :  { %105 = vst.msk [vmem:[#allocation0] sm:$0xf] %vm104_vm9, %v103_v55  }
  0x86   :  { %v115_v56 = vpop.permute.xlu0 %114  }
  0x87   :  { %117 = vst.msk [vmem:[#allocation0] sm:$0xf] %vm116_vm10, %v115_v56   ;;  %v127_v57 = vpop.permute.xlu1 %126  }
  0x88   :  { %129 = vst.msk [vmem:[#allocation0] sm:$0xf] %vm128_vm11, %v127_v57  }
  0x8a   :  { %v139_v58 = vpop.permute.xlu0 %138  }
  0x8b   :  { %141 = vst.msk [vmem:[#allocation0] sm:$0xf] %vm140_vm12, %v139_v58   ;;  %v151_v59 = vpop.permute.xlu1 %150  }
  0x8c   :  { %153 = vst.msk [vmem:[#allocation0] sm:$0xf] %vm152_vm13, %v151_v59  }
  0x8e   :  { %v163_v60 = vpop.permute.xlu0 %162  }
  0x8f   :  { %165 = vst.msk [vmem:[#allocation0] sm:$0xf] %vm164_vm14, %v163_v60   ;;  %v175_v61 = vpop.permute.xlu1 %174  }
  0x90   :  { %177 = vst.msk [vmem:[#allocation0] sm:$0xf] %vm176_vm15, %v175_v61  }
  0x92   :  { %v187_v62 = vpop.permute.xlu0 %186  }
  0x93   :  { %189 = vst.msk [vmem:[#allocation0] sm:$0xf] %vm188_vm0, %v187_v62  }
  0x9a   :  { %v193_v63 = vld [vmem:[#allocation0] sm:$0xf] }
  0x9b   :  { %195 = vst [vmem:[%s382_s1] sm:$0xf] %v193_v63 }

// kernel: bottleneck_forward.1
= control target key start
LH: loop header
LB: loop body
LE: loop exit
PB: predicated region body
PF: predicated region fallthrough
CT: control target
= control target key end

     0   :  { %v2443_v59 = vmov 0.0|0.0   ;;  %vm2444_vm0 = vmmov 0   ;;  %vm172_vm1 = vcmask 523264   ;;  %vm373_vm2 = vcmask 1043456   ;;  %s3289_s1 = inlined_call_operand.vmem [shape: f32[256,64], index: 1, kind: input, shape index: {}]   ;;  %s3290_s0 = inlined_call_operand.vmem [shape: f32[32,256], index: 0, kind: input, shape index: {}]   ;;  %s3291_s4 = inlined_call_operand.vmem [shape: f32[64,4], index: 4, kind: input, shape index: {}]   ;;  %s3292_s5 = inlined_call_operand.vmem [shape: f32[4,64], index: 5, kind: input, shape index: {}]   ;;  %s3293_s2 = inlined_call_operand.vmem [shape: f32[384,64], index: 2, kind: input, shape index: {}]   ;;  %s3294_s8 = inlined_call_operand.vmem [shape: f32[1,4], index: 8, kind: input, shape index: {}]   ;;  %s3295_s9 = inlined_call_operand.vmem [shape: f32[1,4], index: 9, kind: input, shape index: {}]   ;;  %s3296_s3 = inlined_call_operand.vmem [shape: f32[64,256], index: 3, kind: input, shape index: {}]   ;;  %s3297_s10 = inlined_call_operand.vmem [shape: f32[1,4], index: 10, kind: input, shape index: {}]   ;;  %s3298_s11 = inlined_call_operand.vmem [shape: f32[1,4], index: 11, kind: input, shape index: {}]   ;;  %s3299_s6 = inlined_call_operand.vmem [shape: f32[256,16], index: 6, kind: input, shape index: {}]   ;;  %s3300_s7 = inlined_call_operand.vmem [shape: f32[16,256], index: 7, kind: input, shape index: {}]   ;;  %s3301_s12 = inlined_call_operand.vmem [shape: f32[1,16], index: 12, kind: input, shape index: {}]   ;;  %s3302_s13 = inlined_call_operand.vmem [shape: f32[1,16], index: 13, kind: input, shape index: {}]   ;;  %s3303_s14 = inlined_call_operand.vmem [shape: f32[32,256], index: 14, kind: output, shape index: {}]  }
   0x1   :  { %v71_v0 = vld [vmem:[%s3289_s1 + $0x80] sm:$0xff]  ;;  %v72_v1 = vld [vmem:[%s3289_s1 + $0x88] sm:$0xff]  ;;  %v73_v5 = vld [vmem:[%s3289_s1 + $0x90] sm:$0xff]  ;;  %2226 = vmatprep.subr.bf16.mxu1 %v2443_v59  ;;  %vm369_vm3 = vcmask 31744   ;;  %vm540_vm4 = vcmask 516096   ;;  %vm1611_vm9 = vcmask 130048  }
   0x2   :  { %v55_v2 = vld [vmem:[%s3289_s1] sm:$0xff]  ;;  %v2194_v3 = vpack.c.bf16 %v72_v1, %v71_v0  ;;  %v56_v4 = vld [vmem:[%s3289_s1 + $0x8] sm:$0xff]  ;;  %v74_v6 = vld [vmem:[%s3289_s1 + $0x98] sm:$0xff] }
   0x3   :  { %v2196_v7 = vpack.c.bf16 %v56_v4, %v55_v2  ;;  %v2198_v8 = vpack.c.bf16 %v74_v6, %v73_v5  ;;  %v57_v9 = vld [vmem:[%s3289_s1 + $0x10] sm:$0xff]  ;;  %v58_v10 = vld [vmem:[%s3289_s1 + $0x18] sm:$0xff]  ;;  %v75_v11 = vld [vmem:[%s3289_s1 + $0xa0] sm:$0xff]  ;;  %v2445_v5 = vmov 0.0  }
   0x4   :  { %2195 = vmatprep.subr.bf16.mxu0 %v2194_v3  ;;  %v76_v12 = vld [vmem:[%s3289_s1 + $0xa8] sm:$0xff]  ;;  %v2200_v13 = vpack.c.bf16 %v58_v10, %v57_v9  ;;  %v59_v15 = vld [vmem:[%s3289_s1 + $0x20] sm:$0xff]  ;;  %v77_v17 = vld [vmem:[%s3289_s1 + $0xb0] sm:$0xff]  ;;  %2076 = vmatprep.mubr.msk.f32.mxu1 %vm2444_vm0, %v2445_v5  ;;  %547 = vst [vmem:[#allocation3] sm:$0xff] %v2445_v5 }
   0x5   :  { %2197 = vmatpush3.bf16.msra.mxu0 %v2196_v7  ;;  %v2202_v14 = vpack.c.bf16 %v76_v12, %v75_v11  ;;  %v60_v16 = vld [vmem:[%s3289_s1 + $0x28] sm:$0xff]  ;;  %v78_v18 = vld [vmem:[%s3289_s1 + $0xb8] sm:$0xff]  ;;  %v61_v21 = vld [vmem:[%s3289_s1 + $0x30] sm:$0xff]  ;;  %548 = vst [vmem:[#allocation3 + $0x8] sm:$0xff] %v2445_v5 }
   0x6   :  { %2199 = vmatprep.subr.bf16.mxu0 %v2198_v8  ;;  %v2204_v19 = vpack.c.bf16 %v60_v16, %v59_v15  ;;  %v2206_v20 = vpack.c.bf16 %v78_v18, %v77_v17  ;;  %v62_v22 = vld [vmem:[%s3289_s1 + $0x38] sm:$0xff]  ;;  %v79_v23 = vld [vmem:[%s3289_s1 + $0xc0] sm:$0xff]  ;;  %v80_v24 = vld [vmem:[%s3289_s1 + $0xc8] sm:$0xff]  ;;  %549 = vst [vmem:[#allocation3 + $0x10] sm:$0xff] %v2445_v5 }
   0x7   :  { %v48_v25 = vld [vmem:[%s3290_s0 + $0x8] sm:$0xff]  ;;  %v2208_v26 = vpack.c.bf16 %v62_v22, %v61_v21  ;;  %v2210_v27 = vpack.c.bf16 %v80_v24, %v79_v23  ;;  %v63_v28 = vld [vmem:[%s3289_s1 + $0x40] sm:$0xff]  ;;  %v81_v30 = vld [vmem:[%s3289_s1 + $0xd0] sm:$0xff]  ;;  %550 = vst [vmem:[#allocation3 + $0x18] sm:$0xff] %v2445_v5 }
   0x8   :  { %151 = vmatprep.mubr.f32.mxu0 %v48_v25  ;;  %v64_v29 = vld [vmem:[%s3289_s1 + $0x48] sm:$0xff]  ;;  %v82_v31 = vld [vmem:[%s3289_s1 + $0xd8] sm:$0xff]  ;;  %v65_v34 = vld [vmem:[%s3289_s1 + $0x50] sm:$0xff]  ;;  %551 = vst [vmem:[#allocation3 + $0x20] sm:$0xff] %v2445_v5 }
   0x9   :  { %2201 = vmatpush3.bf16.msra.mxu0 %v2200_v13  ;;  %v2212_v32 = vpack.c.bf16 %v64_v29, %v63_v28  ;;  %v2214_v33 = vpack.c.bf16 %v82_v31, %v81_v30  ;;  %v66_v35 = vld [vmem:[%s3289_s1 + $0x58] sm:$0xff]  ;;  %v83_v36 = vld [vmem:[%s3289_s1 + $0xe0] sm:$0xff]  ;;  %v84_v37 = vld [vmem:[%s3289_s1 + $0xe8] sm:$0xff]  ;;  %552 = vst [vmem:[#allocation3 + $0x28] sm:$0xff] %v2445_v5 }
   0xa   :  { %2203 = vmatprep.subr.bf16.mxu0 %v2202_v14  ;;  %v2216_v38 = vpack.c.bf16 %v66_v35, %v65_v34  ;;  %v2218_v39 = vpack.c.bf16 %v84_v37, %v83_v36  ;;  %v67_v40 = vld [vmem:[%s3289_s1 + $0x60] sm:$0xff]  ;;  %v68_v41 = vld [vmem:[%s3289_s1 + $0x68] sm:$0xff]  ;;  %v85_v42 = vld [vmem:[%s3289_s1 + $0xf0] sm:$0xff]  ;;  %553 = vst [vmem:[#allocation3 + $0x30] sm:$0xff] %v2445_v5 }
   0xb   :  { %v86_v43 = vld [vmem:[%s3289_s1 + $0xf8] sm:$0xff]  ;;  %v2220_v44 = vpack.c.bf16 %v68_v41, %v67_v40  ;;  %v69_v46 = vld [vmem:[%s3289_s1 + $0x70] sm:$0xff]  ;;  %v47_v49 = vld [vmem:[%s3290_s0] sm:$0xff]  ;;  %554 = vst [vmem:[#allocation3 + $0x38] sm:$0xff] %v2445_v5 }
   0xc   :  { %v2222_v45 = vpack.c.bf16 %v86_v43, %v85_v42  ;;  %v70_v47 = vld [vmem:[%s3289_s1 + $0x78] sm:$0xff]  ;;  %v49_v51 = vld [vmem:[%s3290_s0 + $0x10] sm:$0xff]  ;;  %v52_v52 = vld [vmem:[%s3290_s0 + $0x28] sm:$0xff]  ;;  %555 = vst [vmem:[#allocation3 + $0x40] sm:$0xff] %v2445_v5 }
   0xd   :  { %2205 = vmatpush3.bf16.msra.mxu0 %v2204_v19  ;;  %v2224_v48 = vpack.c.bf16 %v70_v47, %v69_v46  ;;  %v50_v50 = vld [vmem:[%s3290_s0 + $0x18] sm:$0xff]  ;;  %v51_v53 = vld [vmem:[%s3290_s0 + $0x20] sm:$0xff]  ;;  %v53_v55 = vld [vmem:[%s3290_s0 + $0x30] sm:$0xff]  ;;  %556 = vst [vmem:[#allocation3 + $0x48] sm:$0xff] %v2445_v5 }
   0xe   :  { %2207 = vmatprep.subr.bf16.mxu0 %v2206_v20  ;;  %v54_v54 = vld [vmem:[%s3290_s0 + $0x38] sm:$0xff]  ;;  %v186_v56 = vld [vmem:[%s3291_s4] sm:$0xff]  ;;  %v187_v57 = vld [vmem:[%s3291_s4 + $0x8] sm:$0xff]  ;;  %557 = vst [vmem:[#allocation3 + $0x50] sm:$0xff] %v2445_v5 }
   0xf   :  { %v2647_v58 = vpack.c.bf16 %v187_v57, %v186_v56  ;;  %v188_v60 = vld [vmem:[%s3291_s4 + $0x10] sm:$0xff]  ;;  %v189_v61 = vld [vmem:[%s3291_s4 + $0x18] sm:$0xff]  ;;  %v190_v63 = vld [vmem:[%s3291_s4 + $0x20] sm:$0xff]  ;;  %558 = vst [vmem:[#allocation3 + $0x58] sm:$0xff] %v2445_v5 }
  0x10   :  { %v2658_v62 = vpack.c.bf16 %v189_v61, %v188_v60  ;;  %v191_v0 = vld [vmem:[%s3291_s4 + $0x28] sm:$0xff]  ;;  %v192_v2 = vld [vmem:[%s3291_s4 + $0x30] sm:$0xff]  ;;  %v193_v3 = vld [vmem:[%s3291_s4 + $0x38] sm:$0xff]  ;;  %541 = vst.msk [vmem:[#allocation2] sm:$0x1] %vm540_vm4, %v2445_v5 }
  0x11   :  { %2209 = vmatpush3.bf16.msra.mxu0 %v2208_v26  ;;  %2228 = vmatpush3.bf16.msra.mxu1 %v2647_v58  ;;  %v2668_v1 = vpack.c.bf16 %v191_v0, %v190_v63  ;;  %v2678_v4 = vpack.c.bf16 %v193_v3, %v192_v2  ;;  %542 = vst.msk [vmem:[#allocation2 + $0x21] sm:$0x1] %vm540_vm4, %v2445_v5 }
  0x12   :  { %2211 = vmatprep.subr.bf16.mxu0 %v2210_v27  ;;  %2229 = vmatprep.subr.bf16.mxu1 %v2443_v59 }
  0x15   :  { %2213 = vmatpush3.bf16.msra.mxu0 %v2212_v32  ;;  %2231 = vmatpush3.bf16.msra.mxu1 %v2658_v62 }
  0x16   :  { %2215 = vmatprep.subr.bf16.mxu0 %v2214_v33  ;;  %2232 = vmatprep.subr.bf16.mxu1 %v2443_v59 }
  0x19   :  { %2217 = vmatpush3.bf16.msra.mxu0 %v2216_v38  ;;  %2234 = vmatpush3.bf16.msra.mxu1 %v2668_v1 }
  0x1a   :  { %2219 = vmatprep.subr.bf16.mxu0 %v2218_v39  ;;  %2235 = vmatprep.subr.bf16.mxu1 %v2443_v59 }
  0x1d   :  { %2221 = vmatpush3.bf16.msra.mxu0 %v2220_v44  ;;  %2237 = vmatpush3.bf16.msra.mxu1 %v2678_v4 }
  0x1e   :  { %2223 = vmatprep.subr.bf16.mxu0 %v2222_v45  ;;  %2238 = vmatprep.subr.bf16.mxu1 %v2443_v59 }
  0x21   :  { %2225 = vmatpush3.bf16.msra.mxu0 %v2224_v48  ;;  %v368_v48 = vld [vmem:[%s3292_s5] sm:$0xf] }
  0x24   :  { %152 = vmatmul.mubr.f32.vlgmr.msra.gmra.mrb[0].mxu0 %v47_v49  ;;  %v696_v49 = vld [vmem:[%s3293_s2 + $0x80] sm:$0xff] }
  0x25   :  { %156 = vmatprep.mubr.f32.mxu0 %v50_v50  ;;  %v697_v50 = vld [vmem:[%s3293_s2 + $0x88] sm:$0xff] }
  0x28   :  { %157 = vmatmul.mubr.f32.gmra.mrb[2].mxu0 %v49_v51  ;;  %v2250_v51 = vpack.c.bf16 %v697_v50, %v696_v49  ;;  %v721_v50 = vld [vmem:[%s3293_s2 + $0x148] sm:$0xff] }
  0x29   :  { %161 = vmatprep.mubr.f32.mxu0 %v52_v52  ;;  %v680_v52 = vld [vmem:[%s3293_s2] sm:$0xff] }
  0x2a   :  { %2251 = vmatprep.subr.bf16.mxu0 %v2250_v51  ;;  %v688_v51 = vld [vmem:[%s3293_s2 + $0x40] sm:$0xff] }
  0x2c   :  { %162 = vmatmul.mubr.f32.gmra.mrb[4].mxu0 %v51_v53  ;;  %v681_v53 = vld [vmem:[%s3293_s2 + $0x8] sm:$0xff] }
  0x2d   :  { %166 = vmatprep.mubr.f32.mxu0 %v54_v54  ;;  %v2252_v54 = vpack.c.bf16 %v681_v53, %v680_v52  ;;  %v689_v52 = vld [vmem:[%s3293_s2 + $0x48] sm:$0xff] }
  0x2f   :  { %2253 = vmatpush3.bf16.msra.mxu0 %v2252_v54  ;;  %v2268_v54 = vpack.c.bf16 %v689_v52, %v688_v51 }
  0x30   :  { %167 = vmatmul.mubr.f32.gmra.mrb[6].mxu0 %v53_v55 }
  0xf7   :  { %v1870_v6 = vpop.f32.mrb[0].mxu0 }
  0xf8   :  { %v1871_v7 = vpop.f32.mrb[1].mxu0 }
  0xf9   :  { %v2696_v8 = vadd.f32 %v1871_v7, %v1870_v6  ;;  %v361_v6 = vld [vmem:[%s3294_s8] sm:$0x1] }
  0xfa   :  { %v712_v7 = vld [vmem:[%s3293_s2 + $0x100] sm:$0xff] }
  0xfb   :  { %v1873_v9 = vpop.f32.mrb[2].mxu0  ;;  %v173_v17 = vsel %vm172_vm1, %v2696_v8, 0.0  ;;  %v267_v18 = vmul.f32 %v2696_v8, %v2696_v8 }
  0xfc   :  { %v1874_v10 = vpop.f32.mrb[3].mxu0 }
  0xfd   :  { %v2698_v11 = vadd.f32 %v1874_v10, %v1873_v9  ;;  %v271_v27 = vsel %vm172_vm1, %v267_v18, 0.0  ;;  %v713_v9 = vld [vmem:[%s3293_s2 + $0x108] sm:$0xff]  ;;  %v698_v18 = vld [vmem:[%s3293_s2 + $0x90] sm:$0xff] }
  0xff   :  { %v1876_v12 = vpop.f32.mrb[4].mxu0  ;;  %v174_v14 = vsel %vm172_vm1, %v2698_v11, 0.0  ;;  %v268_v15 = vmul.f32 %v2698_v11, %v2698_v11 }
 0x100   :  { %v1877_v13 = vpop.f32.mrb[5].mxu0  ;;  %v175_v22 = vadd.f32 %v174_v14, %v173_v17  ;;  %v365_v14 = vld [vmem:[%s3295_s9] sm:$0x1] }
 0x101   :  { %v2704_v16 = vadd.f32 %v1877_v13, %v1876_v12  ;;  %v272_v24 = vsel %vm172_vm1, %v268_v15, 0.0  ;;  %v2282_v13 = vpack.c.bf16 %v713_v9, %v712_v7  ;;  %v709_v7 = vld [vmem:[%s3293_s2 + $0xe8] sm:$0xff]  ;;  %v724_v9 = vld [vmem:[%s3293_s2 + $0x160] sm:$0xff] }
 0x102   :  { %v273_v31 = vadd.f32 %v272_v24, %v271_v27  ;;  %v683_v24 = vld [vmem:[%s3293_s2 + $0x18] sm:$0xff] }
 0x103   :  { %v176_v19 = vsel %vm172_vm1, %v2704_v16, 0.0  ;;  %v269_v20 = vmul.f32 %v2704_v16, %v2704_v16  ;;  %v1879_v21 = vpop.f32.mrb[6].mxu0 }
 0x104   :  { %v1880_v23 = vpop.f32.mrb[7].mxu0  ;;  %v177_v26 = vadd.f32 %v176_v19, %v175_v22  ;;  %v699_v19 = vld [vmem:[%s3293_s2 + $0x98] sm:$0xff] }
 0x105   :  { %v2715_v25 = vadd.f32 %v1880_v23, %v1879_v21  ;;  %v274_v28 = vsel %vm172_vm1, %v269_v20, 0.0  ;;  %v714_v20 = vld [vmem:[%s3293_s2 + $0x110] sm:$0xff]  ;;  %v2254_v21 = vpack.c.bf16 %v699_v19, %v698_v18  ;;  %v715_v22 = vld [vmem:[%s3293_s2 + $0x118] sm:$0xff] }
 0x106   :  { %v275_v34 = vadd.f32 %v274_v28, %v273_v31  ;;  %v682_v23 = vld [vmem:[%s3293_s2 + $0x10] sm:$0xff]  ;;  %v700_v28 = vld [vmem:[%s3293_s2 + $0xa0] sm:$0xff]  ;;  %v711_v18 = vld [vmem:[%s3293_s2 + $0xf8] sm:$0xff] }
 0x107   :  { %v178_v29 = vsel %vm172_vm1, %v2715_v25, 0.0  ;;  %v270_v30 = vmul.f32 %v2715_v25, %v2715_v25  ;;  %v2256_v27 = vpack.c.bf16 %v683_v24, %v682_v23  ;;  %2255 = vmatprep.subr.bf16.mxu0 %v2254_v21  ;;  %v726_v19 = vld [vmem:[%s3293_s2 + $0x170] sm:$0xff]  ;;  %v695_v24 = vld [vmem:[%s3293_s2 + $0x78] sm:$0xff] }
 0x108   :  { %v179_v32 = vadd.f32 %v178_v29, %v177_v26  ;;  %v2286_v26 = vpack.c.bf16 %v715_v22, %v714_v20  ;;  %v701_v29 = vld [vmem:[%s3293_s2 + $0xa8] sm:$0xff]  ;;  %v727_v20 = vld [vmem:[%s3293_s2 + $0x178] sm:$0xff]  ;;  %v694_v23 = vld [vmem:[%s3293_s2 + $0x70] sm:$0xff] }
 0x109   :  { %v276_v33 = vsel %vm172_vm1, %v270_v30, 0.0  ;;  %2257 = vmatpush3.bf16.msra.mxu0 %v2256_v27  ;;  %v716_v30 = vld [vmem:[%s3293_s2 + $0x120] sm:$0xff]  ;;  %v2258_v31 = vpack.c.bf16 %v701_v29, %v700_v28  ;;  %v2280_v27 = vpack.c.bf16 %v695_v24, %v694_v23  ;;  %v520_v28 = vlaneseq }
 0x10a   :  { %v180_v35 = vrot.slane %v179_v32, 4  ;;  %v277_v37 = vadd.f32 %v276_v33, %v275_v34  ;;  %v684_v33 = vld [vmem:[%s3293_s2 + $0x20] sm:$0xff]  ;;  %v685_v34 = vld [vmem:[%s3293_s2 + $0x28] sm:$0xff] }
 0x10b   :  { %2259 = vmatprep.subr.bf16.mxu0 %v2258_v31  ;;  %v521_v29 = vshrl.u32 %v520_v28, 7 }
 0x10c   :  { %v181_v36 = vadd.f32 %v180_v35, %v179_v32  ;;  %v278_v39 = vrot.slane %v277_v37, 4  ;;  %v717_v32 = vld [vmem:[%s3293_s2 + $0x128] sm:$0xff] }
 0x10d   :  { %v2290_v35 = vpack.c.bf16 %v717_v32, %v716_v30  ;;  %v2902_v30 = vsub.s32 0, %v521_v29 }
 0x10e   :  { %v182_v38 = vrot.slane %v181_v36, 2  ;;  %v279_v42 = vadd.f32 %v278_v39, %v277_v37  ;;  %v702_v37 = vld [vmem:[%s3293_s2 + $0xb0] sm:$0xff] }
 0x10f   :  { %v718_v39 = vld [vmem:[%s3293_s2 + $0x130] sm:$0xff] }
 0x110   :  { %v183_v40 = vadd.f32 %v182_v38, %v181_v36  ;;  %v280_v44 = vrot.slane %v279_v42, 2  ;;  %v2260_v36 = vpack.c.bf16 %v685_v34, %v684_v33  ;;  %v703_v38 = vld [vmem:[%s3293_s2 + $0xb8] sm:$0xff] }
 0x112   :  { %v184_v41 = vrot.slane %v183_v40, 1  ;;  %v281_v45 = vadd.f32 %v280_v44, %v279_v42  ;;  %2261 = vmatpush3.bf16.msra.mxu0 %v2260_v36  ;;  %v686_v42 = vld [vmem:[%s3293_s2 + $0x30] sm:$0xff] }
 0x114   :  { %v185_v43 = vadd.f32 %v184_v41, %v183_v40  ;;  %v282_v46 = vrot.slane %v281_v45, 1  ;;  %v2262_v40 = vpack.c.bf16 %v703_v38, %v702_v37  ;;  %v719_v41 = vld [vmem:[%s3293_s2 + $0x138] sm:$0xff] }
 0x115   :  { %v2294_v44 = vpack.c.bf16 %v719_v41, %v718_v39 }
 0x116   :  { %2077 = vmatmul.mubr.msk.f32.vlgmr.msra.gmra.mrb[0].mxu1 %vm172_vm1, %v185_v43  ;;  %v283_v47 = vadd.f32 %v282_v46, %v281_v45  ;;  %v687_v43 = vld [vmem:[%s3293_s2 + $0x38] sm:$0xff]  ;;  %2263 = vmatprep.subr.bf16.mxu0 %v2262_v40  ;;  %v704_v46 = vld [vmem:[%s3293_s2 + $0xc0] sm:$0xff] }
 0x117   :  { %2240 = vmatpush3.bf16.msra.mxu1 %v2647_v58  ;;  %2095 = vmatprep.mubr.msk.f32.mxu1 %vm2444_vm0, %v2445_v5  ;;  %v2264_v45 = vpack.c.bf16 %v687_v43, %v686_v42 }
 0x118   :  { %2241 = vmatprep.subr.bf16.mxu1 %v2443_v59 }
 0x119   :  { %2265 = vmatpush3.bf16.msra.mxu0 %v2264_v45  ;;  %v561_v45 = vadd.s32 8, %v521_v29 }
 0x11b   :  { %2243 = vmatpush3.bf16.msra.mxu1 %v2658_v62 }
 0x11c   :  { %2244 = vmatprep.subr.bf16.mxu1 %v2443_v59 }
 0x11f   :  { %2246 = vmatpush3.bf16.msra.mxu1 %v2668_v1 }
 0x120   :  { %2247 = vmatprep.subr.bf16.mxu1 %v2443_v59 }
 0x123   :  { %2249 = vmatpush3.bf16.msra.mxu1 %v2678_v4 }
 0x124   :  { %2098 = vmatprep.subr.mxu1 %v2445_v5 }
 0x126   :  { %2096 = vmatmul.mubr.msk.f32.vlgmr.msra.gmra.mrb[2].mxu1 %vm172_vm1, %v283_v47  ;;  %v705_v47 = vld [vmem:[%s3293_s2 + $0xc8] sm:$0xff] }
 0x127   :  { %2100 = vmatprep.mubr.msk.f32.mxu1 %vm2444_vm0, %v2445_v5  ;;  %2099 = vmatpush3.msk.msra.mxu1 %vm373_vm2, %v368_v48  ;;  %v2266_v49 = vpack.c.bf16 %v705_v47, %v704_v46 }
 0x128   :  { %2103 = vmatprep.subr.mxu1 %v2445_v5 }
 0x129   :  { %2267 = vmatprep.subr.bf16.mxu0 %v2266_v49 }
 0x12a   :  { %2269 = vmatpush3.bf16.msra.mxu0 %v2268_v54 }
 0x1e9   :  { %v263_v55 = vpop.f32.mrb[0].mxu1 }
 0x1ea   :  { %v2078_v56 = vpop.f32.mrb[1].mxu1  ;;  %v357_v57 = vmul.f32 0.001953125, %v263_v55  ;;  %v706_v55 = vld [vmem:[%s3293_s2 + $0xd0] sm:$0xff] }
 0x1eb   :  { %v707_v56 = vld [vmem:[%s3293_s2 + $0xd8] sm:$0xff] }
 0x1ec   :  { %v359_v61 = vmul.f32 %v357_v57, %v357_v57 }
 0x1f9   :  { %v353_v60 = vpop.f32.mrb[2].mxu1 }
 0x1fa   :  { %v358_v63 = vmul.f32 0.001953125, %v353_v60  ;;  %v2097_v0 = vpop.f32.mrb[3].mxu1  ;;  %v2270_v60 = vpack.c.bf16 %v707_v56, %v706_v55 }
 0x1fb   :  { %v691_v0 = vld [vmem:[%s3293_s2 + $0x58] sm:$0xff] }
 0x1fc   :  { %v360_v2 = vsub.f32 %v358_v63, %v359_v61  ;;  %v723_v61 = vld [vmem:[%s3293_s2 + $0x158] sm:$0xff]  ;;  %v690_v63 = vld [vmem:[%s3293_s2 + $0x50] sm:$0xff]  ;;  %2271 = vmatprep.subr.bf16.mxu0 %v2270_v60 }
 0x1fe   :  { %v362_v3 = vadd.f32 1e-05, %v360_v2 }
 0x200   :  { %2429 = vrsqrt.f32 %v362_v3  ;;  %v2272_v3 = vpack.c.bf16 %v691_v0, %v690_v63 }
 0x202   :  { %2273 = vmatpush3.bf16.msra.mxu0 %v2272_v3 }
 0x20a   :  { %v2430_v10 = vpop.eup %2429 }
 0x20b   :  { %v364_v12 = vmul.f32 %v2430_v10, %v361_v6  ;;  %v708_v6 = vld [vmem:[%s3293_s2 + $0xe0] sm:$0xff] }
 0x20c   :  { %v2274_v10 = vpack.c.bf16 %v709_v7, %v708_v6 }
 0x20d   :  { %2101 = vmatmul.mubr.msk.f32.vlgmr.msra.gmra.mrb[4].mxu1 %vm369_vm3, %v364_v12  ;;  %v366_v15 = vmul.f32 %v364_v12, %v357_v57  ;;  %v722_v57 = vld [vmem:[%s3293_s2 + $0x150] sm:$0xff]  ;;  %v725_v12 = vld [vmem:[%s3293_s2 + $0x168] sm:$0xff] }
 0x20e   :  { %2104 = vmatpush3.msk.msra.mxu1 %vm373_vm2, %v368_v48  ;;  %2105 = vmatprep.mubr.msk.f32.mxu1 %vm2444_vm0, %v2445_v5  ;;  %v720_v48 = vld [vmem:[%s3293_s2 + $0x140] sm:$0xff]  ;;  %v2302_v2 = vpack.c.bf16 %v723_v61, %v722_v57 }
 0x20f   :  { %v367_v17 = vsub.f32 %v365_v14, %v366_v15  ;;  %2283 = vmatprep.subr.bf16.mxu1 %v2282_v13  ;;  %v2298_v53 = vpack.c.bf16 %v721_v50, %v720_v48  ;;  %v693_v14 = vld [vmem:[%s3293_s2 + $0x68] sm:$0xff]  ;;  %v2306_v15 = vpack.c.bf16 %v725_v12, %v724_v9  ;;  %2275 = vmatprep.subr.bf16.mxu0 %v2274_v10 }
 0x211   :  { %2106 = vmatmul.mubr.msk.f32.vlgmr.msra.gmra.mrb[6].mxu1 %vm369_vm3, %v367_v17  ;;  %v710_v17 = vld [vmem:[%s3293_s2 + $0xf0] sm:$0xff] }
 0x212   :  { %2285 = vmatpush3.bf16.msra.mxu1 %v2282_v13  ;;  %v692_v13 = vld [vmem:[%s3293_s2 + $0x60] sm:$0xff]  ;;  %v2278_v22 = vpack.c.bf16 %v711_v18, %v710_v17 }
 0x213   :  { %2287 = vmatprep.subr.bf16.mxu1 %v2286_v26  ;;  %v2276_v21 = vpack.c.bf16 %v693_v14, %v692_v13 }
 0x215   :  { %2277 = vmatpush3.bf16.msra.mxu0 %v2276_v21 }
 0x216   :  { %2289 = vmatpush3.bf16.msra.mxu1 %v2286_v26  ;;  %v2310_v26 = vpack.c.bf16 %v727_v20, %v726_v19  ;;  %2279 = vmatprep.subr.bf16.mxu0 %v2278_v22 }
 0x217   :  { %2291 = vmatprep.subr.bf16.mxu1 %v2290_v35 }
 0x219   :  { %2281 = vmatpush3.bf16.msra.mxu0 %v2280_v27 }
 0x21a   :  { %2293 = vmatpush3.bf16.msra.mxu1 %v2290_v35  ;;  %2314 = vmatprep.subr.bf16.mxu0 %v2443_v59 }
 0x21b   :  { %2295 = vmatprep.subr.bf16.mxu1 %v2294_v44 }
 0x21e   :  { %2297 = vmatpush3.bf16.msra.mxu1 %v2294_v44 }
 0x21f   :  { %2299 = vmatprep.subr.bf16.mxu1 %v2298_v53 }
 0x222   :  { %2301 = vmatpush3.bf16.msra.mxu1 %v2298_v53 }
 0x223   :  { %2303 = vmatprep.subr.bf16.mxu1 %v2302_v2 }
 0x226   :  { %2305 = vmatpush3.bf16.msra.mxu1 %v2302_v2 }
 0x227   :  { %2307 = vmatprep.subr.bf16.mxu1 %v2306_v15 }
 0x22a   :  { %2309 = vmatpush3.bf16.msra.mxu1 %v2306_v15 }
 0x22b   :  { %2311 = vmatprep.subr.bf16.mxu1 %v2310_v26 }
 0x22e   :  { %2313 = vmatpush3.bf16.msra.mxu1 %v2310_v26 }
 0x22f   :  { %2326 = vmatprep.subr.bf16.mxu1 %v2443_v59 }
 0x2e0   :  { %v443_v31 = vpop.f32.mrb[4].mxu1 }
 0x2e1   :  { %v523_v32 = vrot.slane %v443_v31, %v2902_v30  ;;  %v2102_v33 = vpop.f32.mrb[5].mxu1 }
 0x2e3   :  { %v524_v34 = vmul.f32 %v2696_v8, %v523_v32  ;;  %v525_v36 = vmul.f32 %v2698_v11, %v523_v32  ;;  %v526_v37 = vmul.f32 %v2704_v16, %v523_v32  ;;  %v527_v38 = vmul.f32 %v2715_v25, %v523_v32 }
 0x2e4   :  { %v516_v35 = vpop.f32.mrb[6].mxu1  ;;  %v563_v8 = vadd.s32 24, %v521_v29  ;;  %v562_v11 = vadd.s32 16, %v521_v29  ;;  %v568_v16 = vand.u32 15, %v521_v29  ;;  %v575_v25 = vand.u32 15, %v561_v45 }
 0x2e5   :  { %v531_v39 = vrot.slane %v516_v35, %v2902_v30  ;;  %v2107_v40 = vpop.f32.mrb[7].mxu1 }
 0x2e6   :  { %v589_v50 = vand.u32 15, %v563_v8  ;;  %v582_v51 = vand.u32 15, %v562_v11  ;;  %vm616_vm5 = vcmp.ge.s32.totalorder %v568_v16, 1  ;;  %vm2914_vm6 = vcmp.le.s32.totalorder %v575_v25, 14 }
 0x2e7   :  { %v532_v41 = vadd.f32 %v531_v39, %v524_v34  ;;  %v533_v42 = vadd.f32 %v531_v39, %v525_v36  ;;  %v534_v43 = vadd.f32 %v531_v39, %v526_v37  ;;  %v535_v44 = vadd.f32 %v531_v39, %v527_v38 }
 0x2e8   :  { %vm2918_vm7 = vcmp.le.s32.totalorder %v589_v50, 14  ;;  %vm2924_vm8 = vcmp.ge.s32.totalorder %v582_v51, 1 }
 0x2e9   :  { %v536_v46 = vmax.f32 %v532_v41, 0.0  ;;  %v537_v47 = vmax.f32 %v533_v42, 0.0  ;;  %v538_v48 = vmax.f32 %v534_v43, 0.0  ;;  %v539_v49 = vmax.f32 %v535_v44, 0.0 }
 0x2eb   :  { %543 = vst.msk [vmem:[#allocation2 + $0x1] sm:$0xff] %vm172_vm1, %v536_v46  ;;  %544 = vst.msk [vmem:[#allocation2 + $0x9] sm:$0xff] %vm172_vm1, %v537_v47 }
 0x2ec   :  { %545 = vst.msk [vmem:[#allocation2 + $0x11] sm:$0xff] %vm172_vm1, %v538_v48  ;;  %546 = vst.msk [vmem:[#allocation2 + $0x19] sm:$0xff] %vm172_vm1, %v539_v49 }
 0x2f2   :  { %v636_v53 = vld [vmem:[#allocation2 + $0x1] sm:$0xff]  ;;  %v637_v61 = vld [vmem:[#allocation2 + $0x9] sm:$0xff] }
 0x2f3   :  { %v644_v54 = vld [vmem:[#allocation2 + $0x2] sm:$0xff]  ;;  %640 = vst.msk [vmem:[#allocation3 + $0x8] sm:$0xff] %vm172_vm1, %v636_v53  ;;  %v645_v60 = vld [vmem:[#allocation2 + $0xa] sm:$0xff]  ;;  %v646_v63 = vld [vmem:[#allocation2 + $0x12] sm:$0xff] }
 0x2f4   :  { %v612_v55 = vld [vmem:[#allocation2] sm:$0xff]  ;;  %664 = vst.msk [vmem:[#allocation3 + $0x10] sm:$0xff] %vm172_vm1, %v644_v54  ;;  %v661_v2 = vsel %vm2914_vm6, %v645_v60, 0.0  ;;  %641 = vst.msk [vmem:[#allocation3 + $0x20] sm:$0xff] %vm172_vm1, %v637_v61  ;;  %v613_v3 = vld [vmem:[#allocation2 + $0x8] sm:$0xff] }
 0x2f5   :  { %v628_v57 = vsel %vm616_vm5, %v612_v55, 0.0  ;;  %666 = vst.msk [vmem:[#allocation3 + $0x40] sm:$0xff] %vm172_vm1, %v646_v63  ;;  %v647_v6 = vld [vmem:[#allocation2 + $0x1a] sm:$0xff]  ;;  %v638_v7 = vld [vmem:[#allocation2 + $0x11] sm:$0xff]  ;;  %665 = vst.msk [vmem:[#allocation3 + $0x28] sm:$0xff] %vm172_vm1, %v661_v2 }
 0x2f6   :  { %632 = vst.msk [vmem:[#allocation3] sm:$0xff] %vm172_vm1, %v628_v57  ;;  %633 = vst.msk [vmem:[#allocation3 + $0x18] sm:$0xff] %vm172_vm1, %v613_v3  ;;  %v663_v9 = vsel %vm2918_vm7, %v647_v6, 0.0  ;;  %v614_v10 = vld [vmem:[#allocation2 + $0x10] sm:$0xff]  ;;  %v639_v12 = vld [vmem:[#allocation2 + $0x19] sm:$0xff] }
 0x2f7   :  { %642 = vst.msk [vmem:[#allocation3 + $0x38] sm:$0xff] %vm172_vm1, %v638_v7  ;;  %v615_v13 = vld [vmem:[#allocation2 + $0x18] sm:$0xff]  ;;  %667 = vst.msk [vmem:[#allocation3 + $0x58] sm:$0xff] %vm172_vm1, %v663_v9  ;;  %v630_v14 = vsel %vm2924_vm8, %v614_v10, 0.0 }
 0x2f8   :  { %643 = vst.msk [vmem:[#allocation3 + $0x50] sm:$0xff] %vm172_vm1, %v639_v12  ;;  %635 = vst.msk [vmem:[#allocation3 + $0x48] sm:$0xff] %vm172_vm1, %v615_v13 }
 0x2f9   :  { %634 = vst.msk [vmem:[#allocation3 + $0x30] sm:$0xff] %vm172_vm1, %v630_v14 }
 0x2fa   :  { %v669_v15 = vld [vmem:[#allocation3 + $0x8] sm:$0xff] }
 0x2fb   :  { %v670_v17 = vld [vmem:[#allocation3 + $0x10] sm:$0xff]  ;;  %792 = vmatprep.mubr.f32.mxu0 %v669_v15  ;;  %v672_v20 = vld [vmem:[#allocation3 + $0x20] sm:$0xff]  ;;  %v1093_v15 = vld [vmem:[%s3292_s5] sm:$0xf] }
 0x2fc   :  { %2140 = vmatprep.mubr.f32.mxu1 %v670_v17  ;;  %v673_v19 = vld [vmem:[#allocation3 + $0x28] sm:$0xff]  ;;  %v676_v21 = vld [vmem:[#allocation3 + $0x40] sm:$0xff] }
 0x2fd   :  { %v668_v18 = vld [vmem:[#allocation3] sm:$0xff]  ;;  %2141 = vmatmul.mubr.f32.vlgmr.msra.gmra.mrb[8].mxu1 %v673_v19  ;;  %v671_v22 = vld [vmem:[#allocation3 + $0x18] sm:$0xff] }
 0x2fe   :  { %793 = vmatmul.mubr.f32.vlgmr.msra.gmra.mrb[8].mxu0 %v668_v18  ;;  %2143 = vmatprep.mubr.f32.mxu1 %v676_v21  ;;  %v679_v23 = vld [vmem:[#allocation3 + $0x58] sm:$0xff]  ;;  %v1264_v17 = vld [vmem:[%s3296_s3 + $0x8] sm:$0xff]  ;;  %v1266_v18 = vld [vmem:[%s3296_s3 + $0x18] sm:$0xff] }
 0x2ff   :  { %797 = vmatprep.mubr.f32.mxu0 %v672_v20  ;;  %2316 = vmatpush3.bf16.msra.mxu0 %v2647_v58  ;;  %v675_v24 = vld [vmem:[#allocation3 + $0x38] sm:$0xff]  ;;  %v678_v27 = vld [vmem:[#allocation3 + $0x50] sm:$0xff]  ;;  %v2338_v19 = vpack.c.bf16 %v1266_v18, %v1264_v17 }
 0x300   :  { %2317 = vmatprep.subr.bf16.mxu0 %v2443_v59  ;;  %2328 = vmatpush3.bf16.msra.mxu1 %v2647_v58  ;;  %v674_v26 = vld [vmem:[#allocation3 + $0x30] sm:$0xff]  ;;  %v677_v58 = vld [vmem:[#allocation3 + $0x48] sm:$0xff] }
 0x301   :  { %2329 = vmatprep.subr.bf16.mxu1 %v2443_v59  ;;  %2144 = vmatmul.mubr.f32.gmra.mrb[10].mxu1 %v679_v23 }
 0x302   :  { %798 = vmatmul.mubr.f32.gmra.mrb[10].mxu0 %v671_v22  ;;  %2181 = vmatprep.mubr.msk.f32.mxu1 %vm2444_vm0, %v2445_v5 }
 0x303   :  { %802 = vmatprep.mubr.f32.mxu0 %v675_v24  ;;  %2319 = vmatpush3.bf16.msra.mxu0 %v2658_v62 }
 0x304   :  { %2320 = vmatprep.subr.bf16.mxu0 %v2443_v59  ;;  %2331 = vmatpush3.bf16.msra.mxu1 %v2658_v62 }
 0x305   :  { %2332 = vmatprep.subr.bf16.mxu1 %v2443_v59 }
 0x306   :  { %803 = vmatmul.mubr.f32.gmra.mrb[12].mxu0 %v674_v26 }
 0x307   :  { %807 = vmatprep.mubr.f32.mxu0 %v678_v27  ;;  %2322 = vmatpush3.bf16.msra.mxu0 %v2668_v1 }
 0x308   :  { %2323 = vmatprep.subr.bf16.mxu0 %v2443_v59  ;;  %2334 = vmatpush3.bf16.msra.mxu1 %v2668_v1 }
 0x309   :  { %2335 = vmatprep.subr.bf16.mxu1 %v2443_v59 }
 0x30a   :  { %808 = vmatmul.mubr.f32.gmra.mrb[14].mxu0 %v677_v58 }
 0x30b   :  { %2162 = vmatprep.mubr.msk.f32.mxu0 %vm2444_vm0, %v2445_v5  ;;  %2325 = vmatpush3.bf16.msra.mxu0 %v2678_v4 }
 0x30c   :  { %2337 = vmatpush3.bf16.msra.mxu1 %v2678_v4  ;;  %2189 = vmatprep.subr.mxu0 %v2445_v5 }
 0x30d   :  { %2184 = vmatprep.subr.mxu1 %v2445_v5 }
 0x3d0   :  { %v2142_v28 = vpop.f32.mrb[8].mxu1 }
 0x3d1   :  { %v1936_v62 = vpop.f32.mrb[8].mxu0  ;;  %v879_v32 = vpop.f32.mrb[9].mxu1 }
 0x3d2   :  { %v1937_v29 = vpop.f32.mrb[9].mxu0 }
 0x3d3   :  { %v1938_v31 = vadd.f32 %v1937_v29, %v1936_v62 }
 0x3d4   :  { %v2145_v59 = vpop.f32.mrb[10].mxu1 }
 0x3d5   :  { %v2964_v1 = vadd.f32 %v1938_v31, %v879_v32  ;;  %v1939_v33 = vpop.f32.mrb[10].mxu0  ;;  %v889_v36 = vpop.f32.mrb[11].mxu1  ;;  %v1263_v32 = vld [vmem:[%s3296_s3] sm:$0xff] }
 0x3d6   :  { %v1940_v34 = vpop.f32.mrb[11].mxu0 }
 0x3d7   :  { %v1941_v35 = vadd.f32 %v1940_v34, %v1939_v33  ;;  %v992_v41 = vmul.f32 %v2964_v1, %v2964_v1  ;;  %v898_v45 = vsel %vm172_vm1, %v2964_v1, 0.0  ;;  %v1265_v33 = vld [vmem:[%s3296_s3 + $0x10] sm:$0xff]  ;;  %v1268_v34 = vld [vmem:[%s3296_s3 + $0x28] sm:$0xff] }
 0x3d9   :  { %v2966_v37 = vadd.f32 %v2142_v28, %v1941_v35  ;;  %v1942_v38 = vpop.f32.mrb[12].mxu0  ;;  %v996_v16 = vsel %vm172_vm1, %v992_v41, 0.0  ;;  %v1086_v28 = vld [vmem:[%s3297_s10] sm:$0x1]  ;;  %v1270_v35 = vld [vmem:[%s3296_s3 + $0x38] sm:$0xff]  ;;  %v1269_v41 = vld [vmem:[%s3296_s3 + $0x30] sm:$0xff] }
 0x3da   :  { %v1943_v4 = vpop.f32.mrb[13].mxu0 }
 0x3db   :  { %v993_v39 = vmul.f32 %v2966_v37, %v2966_v37  ;;  %v1944_v40 = vadd.f32 %v1943_v4, %v1942_v38  ;;  %v899_v42 = vsel %vm172_vm1, %v2966_v37, 0.0  ;;  %v2340_v38 = vpack.c.bf16 %v1265_v33, %v1263_v32  ;;  %v1404_v33 = vld [vmem:[%s3299_s6 + $0x30] sm:$0xff] }
 0x3dc   :  { %v900_v11 = vadd.f32 %v899_v42, %v898_v45  ;;  %v1274_v45 = vld [vmem:[%s3296_s3 + $0x58] sm:$0xff] }
 0x3dd   :  { %v2974_v43 = vadd.f32 %v1944_v40, %v889_v36  ;;  %v1945_v44 = vpop.f32.mrb[14].mxu0  ;;  %v997_v47 = vsel %vm172_vm1, %v993_v39, 0.0  ;;  %v2342_v39 = vpack.c.bf16 %v1270_v35, %v1268_v34  ;;  %v1267_v40 = vld [vmem:[%s3296_s3 + $0x20] sm:$0xff] }
 0x3de   :  { %v1946_v46 = vpop.f32.mrb[15].mxu0  ;;  %v998_v51 = vadd.f32 %v997_v47, %v996_v16  ;;  %v2344_v42 = vpack.c.bf16 %v1269_v41, %v1267_v40  ;;  %v1271_v47 = vld [vmem:[%s3296_s3 + $0x40] sm:$0xff]  ;;  %v1424_v41 = vld [vmem:[%s3299_s6 + $0xd0] sm:$0xff] }
 0x3df   :  { %v901_v48 = vsel %vm172_vm1, %v2974_v43, 0.0  ;;  %v994_v49 = vmul.f32 %v2974_v43, %v2974_v43  ;;  %v1947_v8 = vadd.f32 %v1946_v46, %v1945_v44  ;;  %v1272_v44 = vld [vmem:[%s3296_s3 + $0x48] sm:$0xff]  ;;  %v1422_v35 = vld [vmem:[%s3299_s6 + $0xc0] sm:$0xff] }
 0x3e0   :  { %v902_v52 = vadd.f32 %v901_v48, %v900_v11  ;;  %v2346_v46 = vpack.c.bf16 %v1274_v45, %v1272_v44  ;;  %v1273_v48 = vld [vmem:[%s3296_s3 + $0x50] sm:$0xff]  ;;  %v1278_v11 = vld [vmem:[%s3296_s3 + $0x78] sm:$0xff] }
 0x3e1   :  { %v999_v25 = vsel %vm172_vm1, %v994_v49, 0.0  ;;  %v2985_v50 = vadd.f32 %v2145_v59, %v1947_v8  ;;  %v1090_v59 = vld [vmem:[%s3298_s11] sm:$0x1]  ;;  %v2348_v49 = vpack.c.bf16 %v1273_v48, %v1271_v47  ;;  %v1276_v8 = vld [vmem:[%s3296_s3 + $0x68] sm:$0xff]  ;;  %v1408_v45 = vld [vmem:[%s3299_s6 + $0x50] sm:$0xff] }
 0x3e2   :  { %v1000_v55 = vadd.f32 %v999_v25, %v998_v51  ;;  %v2350_v16 = vpack.c.bf16 %v1278_v11, %v1276_v8  ;;  %v1275_v25 = vld [vmem:[%s3296_s3 + $0x60] sm:$0xff]  ;;  %v1277_v51 = vld [vmem:[%s3296_s3 + $0x70] sm:$0xff] }
 0x3e3   :  { %v903_v53 = vsel %vm172_vm1, %v2985_v50, 0.0  ;;  %v995_v54 = vmul.f32 %v2985_v50, %v2985_v50  ;;  %v1426_v48 = vld [vmem:[%s3299_s6 + $0xe0] sm:$0xff] }
 0x3e4   :  { %v904_v56 = vadd.f32 %v903_v53, %v902_v52  ;;  %v2352_v52 = vpack.c.bf16 %v1277_v51, %v1275_v25  ;;  %v1414_v53 = vld [vmem:[%s3299_s6 + $0x80] sm:$0xff]  ;;  %v1428_v51 = vld [vmem:[%s3299_s6 + $0xf0] sm:$0xff] }
 0x3e5   :  { %v1001_v57 = vsel %vm172_vm1, %v995_v54, 0.0  ;;  %v1415_v54 = vld [vmem:[%s3299_s6 + $0x88] sm:$0xff]  ;;  %v1410_v11 = vld [vmem:[%s3299_s6 + $0x60] sm:$0xff] }
 0x3e6   :  { %v905_v60 = vrot.slane %v904_v56, 4  ;;  %v1002_v61 = vadd.f32 %v1001_v57, %v1000_v55  ;;  %v1398_v55 = vld [vmem:[%s3299_s6] sm:$0xff]  ;;  %v1399_v57 = vld [vmem:[%s3299_s6 + $0x8] sm:$0xff] }
 0x3e8   :  { %v906_v63 = vadd.f32 %v905_v60, %v904_v56  ;;  %v1003_v0 = vrot.slane %v1002_v61, 4  ;;  %v2354_v56 = vpack.c.bf16 %v1415_v54, %v1414_v53  ;;  %v2356_v60 = vpack.c.bf16 %v1399_v57, %v1398_v55  ;;  %v1412_v54 = vld [vmem:[%s3299_s6 + $0x70] sm:$0xff]  ;;  %v1413_v55 = vld [vmem:[%s3299_s6 + $0x78] sm:$0xff] }
 0x3ea   :  { %v907_v2 = vrot.slane %v906_v63, 2  ;;  %v1004_v3 = vadd.f32 %v1003_v0, %v1002_v61 }
 0x3ec   :  { %v908_v6 = vadd.f32 %v907_v2, %v906_v63  ;;  %v1005_v7 = vrot.slane %v1004_v3, 2 }
 0x3ee   :  { %v909_v9 = vrot.slane %v908_v6, 1  ;;  %v1006_v10 = vadd.f32 %v1005_v7, %v1004_v3 }
 0x3f0   :  { %v910_v12 = vadd.f32 %v909_v9, %v908_v6  ;;  %v1007_v13 = vrot.slane %v1006_v10, 1 }
 0x3f2   :  { %v1008_v14 = vadd.f32 %v1007_v13, %v1006_v10  ;;  %2163 = vmatmul.mubr.msk.f32.vlgmr.msra.gmra.mrb[16].mxu0 %vm172_vm1, %v910_v12 }
 0x3f3   :  { %2191 = vmatprep.mubr.msk.f32.mxu0 %vm2444_vm0, %v2445_v5  ;;  %2190 = vmatpush3.msk.msra.mxu0 %vm373_vm2, %v1093_v15 }
 0x3f4   :  { %2182 = vmatmul.mubr.msk.f32.vlgmr.msra.gmra.mrb[12].mxu1 %vm172_vm1, %v1008_v14  ;;  %2339 = vmatprep.subr.bf16.mxu0 %v2338_v19  ;;  %v1417_v19 = vld [vmem:[%s3299_s6 + $0x98] sm:$0xff] }
 0x3f5   :  { %2186 = vmatprep.mubr.msk.f32.mxu1 %vm2444_vm0, %v2445_v5  ;;  %2185 = vmatpush3.msk.msra.mxu1 %vm373_vm2, %v1093_v15 }
 0x3f6   :  { %2355 = vmatprep.subr.bf16.mxu1 %v2354_v56 }
 0x4c5   :  { %v988_v20 = vpop.f32.mrb[16].mxu0 }
 0x4c6   :  { %v1082_v21 = vmul.f32 0.001953125, %v988_v20  ;;  %v2164_v22 = vpop.f32.mrb[17].mxu0 }
 0x4c7   :  { %v1078_v23 = vpop.f32.mrb[12].mxu1  ;;  %v1401_v22 = vld [vmem:[%s3299_s6 + $0x18] sm:$0xff] }
 0x4c8   :  { %v1084_v24 = vmul.f32 %v1082_v21, %v1082_v21  ;;  %v1083_v26 = vmul.f32 0.001953125, %v1078_v23  ;;  %v2183_v27 = vpop.f32.mrb[13].mxu1 }
 0x4ca   :  { %v1085_v58 = vsub.f32 %v1083_v26, %v1084_v24  ;;  %v1418_v24 = vld [vmem:[%s3299_s6 + $0xa0] sm:$0xff]  ;;  %v1419_v26 = vld [vmem:[%s3299_s6 + $0xa8] sm:$0xff] }
 0x4cb   :  { %v2362_v27 = vpack.c.bf16 %v1419_v26, %v1418_v24 }
 0x4cc   :  { %v1087_v62 = vadd.f32 1e-05, %v1085_v58  ;;  %v1402_v58 = vld [vmem:[%s3299_s6 + $0x20] sm:$0xff] }
 0x4ce   :  { %2431 = vrsqrt.f32 %v1087_v62  ;;  %v1403_v62 = vld [vmem:[%s3299_s6 + $0x28] sm:$0xff] }
 0x4d8   :  { %v2432_v29 = vpop.eup %2431 }
 0x4d9   :  { %v1089_v31 = vmul.f32 %v2432_v29, %v1086_v28  ;;  %v2364_v28 = vpack.c.bf16 %v1403_v62, %v1402_v58  ;;  %v1420_v29 = vld [vmem:[%s3299_s6 + $0xb0] sm:$0xff] }
 0x4db   :  { %2187 = vmatmul.mubr.msk.f32.vlgmr.msra.gmra.mrb[14].mxu1 %vm369_vm3, %v1089_v31  ;;  %v1091_v36 = vmul.f32 %v1089_v31, %v1082_v21  ;;  %v1400_v21 = vld [vmem:[%s3299_s6 + $0x10] sm:$0xff]  ;;  %v1421_v31 = vld [vmem:[%s3299_s6 + $0xb8] sm:$0xff] }
 0x4dc   :  { %2357 = vmatpush3.bf16.msra.mxu1 %v2356_v60  ;;  %v2360_v23 = vpack.c.bf16 %v1401_v22, %v1400_v21  ;;  %v2366_v32 = vpack.c.bf16 %v1421_v31, %v1420_v29 }
 0x4dd   :  { %v1092_v4 = vsub.f32 %v1090_v59, %v1091_v36  ;;  %v1405_v59 = vld [vmem:[%s3299_s6 + $0x38] sm:$0xff]  ;;  %v1423_v36 = vld [vmem:[%s3299_s6 + $0xc8] sm:$0xff] }
 0x4de   :  { %v2368_v34 = vpack.c.bf16 %v1405_v59, %v1404_v33 }
 0x4df   :  { %2192 = vmatmul.mubr.msk.f32.vlgmr.msra.gmra.mrb[18].mxu0 %vm369_vm3, %v1092_v4  ;;  %v1406_v4 = vld [vmem:[%s3299_s6 + $0x40] sm:$0xff] }
 0x4e0   :  { %2341 = vmatpush1.bf16.msra.mxu0 %v2340_v38  ;;  %1355 = vmatprep.mubr.f32.mxu0 %v2445_v5  ;;  %v2370_v38 = vpack.c.bf16 %v1423_v36, %v1422_v35 }
 0x4e1   :  { %2343 = vmatprep.subr.bf16.mxu0 %v2342_v39  ;;  %v1407_v39 = vld [vmem:[%s3299_s6 + $0x48] sm:$0xff] }
 0x4e2   :  { %v2372_v40 = vpack.c.bf16 %v1407_v39, %v1406_v4 }
 0x4e4   :  { %2345 = vmatpush1.bf16.msra.mxu0 %v2344_v42  ;;  %v1425_v42 = vld [vmem:[%s3299_s6 + $0xd8] sm:$0xff] }
 0x4e5   :  { %2347 = vmatprep.subr.bf16.mxu0 %v2346_v46  ;;  %v2374_v44 = vpack.c.bf16 %v1425_v42, %v1424_v41  ;;  %v1409_v46 = vld [vmem:[%s3299_s6 + $0x58] sm:$0xff] }
 0x4e6   :  { %v2376_v47 = vpack.c.bf16 %v1409_v46, %v1408_v45 }
 0x4e8   :  { %2349 = vmatpush1.bf16.msra.mxu0 %v2348_v49  ;;  %v1427_v49 = vld [vmem:[%s3299_s6 + $0xe8] sm:$0xff] }
 0x4e9   :  { %2351 = vmatprep.subr.bf16.mxu0 %v2350_v16  ;;  %v2378_v8 = vpack.c.bf16 %v1427_v49, %v1426_v48  ;;  %v1411_v16 = vld [vmem:[%s3299_s6 + $0x68] sm:$0xff] }
 0x4ea   :  { %v2380_v25 = vpack.c.bf16 %v1411_v16, %v1410_v11  ;;  %v1610_v11 = vld [vmem:[%s3300_s7 + $0x18] sm:$0xff]  ;;  %v1607_v16 = vld [vmem:[%s3300_s7] sm:$0xff] }
 0x4ec   :  { %2353 = vmatpush1.bf16.msra.mxu0 %v2352_v52  ;;  %v1429_v52 = vld [vmem:[%s3299_s6 + $0xf8] sm:$0xff] }
 0x4ed   :  { %2387 = vmatprep.subr.bf16.mxu0 %v2354_v56  ;;  %v2382_v53 = vpack.c.bf16 %v1429_v52, %v1428_v51  ;;  %v2384_v56 = vpack.c.bf16 %v1413_v55, %v1412_v54  ;;  %v1609_v51 = vld [vmem:[%s3300_s7 + $0x10] sm:$0xff] }
 0x4ee   :  { %v2420_v52 = vpack.c.bf16 %v1609_v51, %v1607_v16 }
 0x5ae   :  { %v1166_v61 = vpop.f32.mrb[14].mxu1 }
 0x5af   :  { %v1246_v63 = vrot.slane %v1166_v61, %v2902_v30  ;;  %v2188_v0 = vpop.f32.mrb[15].mxu1 }
 0x5b1   :  { %v1247_v2 = vmul.f32 %v1246_v63, %v2964_v1  ;;  %v1248_v6 = vmul.f32 %v1246_v63, %v2966_v37  ;;  %v1249_v7 = vmul.f32 %v1246_v63, %v2974_v43  ;;  %v1250_v9 = vmul.f32 %v1246_v63, %v2985_v50  ;;  %v1416_v50 = vld [vmem:[%s3299_s6 + $0x90] sm:$0xff] }
 0x5b2   :  { %v1239_v3 = vpop.f32.mrb[18].mxu0  ;;  %v2358_v20 = vpack.c.bf16 %v1417_v19, %v1416_v50 }
 0x5b3   :  { %v1254_v10 = vrot.slane %v1239_v3, %v2902_v30  ;;  %v2193_v12 = vpop.f32.mrb[19].mxu0 }
 0x5b4   :  { %2359 = vmatprep.subr.bf16.mxu1 %v2358_v20 }
 0x5b5   :  { %v1255_v13 = vadd.f32 %v1254_v10, %v1247_v2  ;;  %v1256_v14 = vadd.f32 %v1254_v10, %v1248_v6  ;;  %v1257_v15 = vadd.f32 %v1254_v10, %v1249_v7  ;;  %v1258_v17 = vadd.f32 %v1254_v10, %v1250_v9  ;;  %2361 = vmatpush3.bf16.msra.mxu1 %v2360_v23 }
 0x5b6   :  { %2363 = vmatprep.subr.bf16.mxu1 %v2362_v27 }
 0x5b7   :  { %v1259_v18 = vmax.f32 %v1255_v13, 0.0  ;;  %v1260_v1 = vmax.f32 %v1256_v14, 0.0  ;;  %v1261_v37 = vmax.f32 %v1257_v15, 0.0  ;;  %v1262_v43 = vmax.f32 %v1258_v17, 0.0 }
 0x5b9   :  { %1832 = vmatmul.mubr.msk.f32.vlgmr.msra.gmra.mrb[20].mxu0 %vm172_vm1, %v1259_v18  ;;  %2365 = vmatpush3.bf16.msra.mxu1 %v2364_v28 }
 0x5ba   :  { %1361 = vmatprep.mubr.f32.mxu0 %v2445_v5  ;;  %2389 = vmatpush3.bf16.msra.mxu0 %v2356_v60 }
 0x5bb   :  { %2391 = vmatprep.subr.bf16.mxu0 %v2358_v20  ;;  %2367 = vmatprep.subr.bf16.mxu1 %v2366_v32 }
 0x5bd   :  { %1833 = vmatmul.mubr.msk.f32.gmra.mrb[22].mxu0 %vm172_vm1, %v1260_v1  ;;  %2369 = vmatpush3.bf16.msra.mxu1 %v2368_v34 }
 0x5be   :  { %1367 = vmatprep.mubr.f32.mxu0 %v2445_v5  ;;  %2393 = vmatpush3.bf16.msra.mxu0 %v2360_v23 }
 0x5bf   :  { %2395 = vmatprep.subr.bf16.mxu0 %v2362_v27  ;;  %2371 = vmatprep.subr.bf16.mxu1 %v2370_v38 }
 0x5c1   :  { %1834 = vmatmul.mubr.msk.f32.gmra.mrb[24].mxu0 %vm172_vm1, %v1261_v37  ;;  %2373 = vmatpush3.bf16.msra.mxu1 %v2372_v40 }
 0x5c2   :  { %1373 = vmatprep.mubr.f32.mxu0 %v2445_v5  ;;  %2397 = vmatpush3.bf16.msra.mxu0 %v2364_v28 }
 0x5c3   :  { %2399 = vmatprep.subr.bf16.mxu0 %v2366_v32  ;;  %2375 = vmatprep.subr.bf16.mxu1 %v2374_v44 }
 0x5c5   :  { %1835 = vmatmul.mubr.msk.f32.gmra.mrb[26].mxu0 %vm172_vm1, %v1262_v43  ;;  %2377 = vmatpush3.bf16.msra.mxu1 %v2376_v47 }
 0x5c6   :  { %2401 = vmatpush3.bf16.msra.mxu0 %v2368_v34  ;;  %2379 = vmatprep.subr.bf16.mxu1 %v2378_v8 }
 0x5c7   :  { %2403 = vmatprep.subr.bf16.mxu0 %v2370_v38 }
 0x5c9   :  { %2381 = vmatpush3.bf16.msra.mxu1 %v2380_v25 }
 0x5ca   :  { %2405 = vmatpush3.bf16.msra.mxu0 %v2372_v40  ;;  %2383 = vmatprep.subr.bf16.mxu1 %v2382_v53 }
 0x5cb   :  { %2407 = vmatprep.subr.bf16.mxu0 %v2374_v44 }
 0x5cd   :  { %2385 = vmatpush3.bf16.msra.mxu1 %v2384_v56 }
 0x5ce   :  { %2409 = vmatpush3.bf16.msra.mxu0 %v2376_v47 }
 0x5cf   :  { %2411 = vmatprep.subr.bf16.mxu0 %v2378_v8  ;;  %v1608_v8 = vld [vmem:[%s3300_s7 + $0x8] sm:$0xff] }
 0x5d2   :  { %2413 = vmatpush3.bf16.msra.mxu0 %v2380_v25  ;;  %v2418_v25 = vpack.c.bf16 %v1610_v11, %v1608_v8 }
 0x5d3   :  { %2415 = vmatprep.subr.bf16.mxu0 %v2382_v53 }
 0x5d4   :  { %2419 = vmatprep.subr.bf16.mxu1 %v2418_v25 }
 0x5d6   :  { %2417 = vmatpush3.bf16.msra.mxu0 %v2384_v56 }
 0x68c   :  { %v3169_v57 = vpop.f32.mrb[20].mxu0 }
 0x68d   :  { %v3171_v60 = vpop.f32.mrb[21].mxu0  ;;  %v1500_v63 = vmul.f32 %v3169_v57, %v3169_v57 }
 0x68e   :  { %v1501_v6 = vmul.f32 %v3171_v60, %v3171_v60 }
 0x690   :  { %v3173_v61 = vpop.f32.mrb[22].mxu0 }
 0x691   :  { %v1380_v0 = vadd.f32 %v3173_v61, %v3169_v57  ;;  %v1502_v2 = vmul.f32 %v3173_v61, %v3173_v61  ;;  %v3181_v3 = vpop.f32.mrb[23].mxu0 }
 0x692   :  { %v1389_v7 = vadd.f32 %v3181_v3, %v3171_v60  ;;  %v1503_v9 = vmul.f32 %v3181_v3, %v3181_v3 }
 0x693   :  { %v1508_v10 = vadd.f32 %v1502_v2, %v1500_v63 }
 0x694   :  { %v1517_v12 = vadd.f32 %v1503_v9, %v1501_v6  ;;  %v3189_v13 = vpop.f32.mrb[24].mxu0 }
 0x695   :  { %v1381_v14 = vadd.f32 %v1380_v0, %v3189_v13  ;;  %v1504_v15 = vmul.f32 %v3189_v13, %v3189_v13  ;;  %v3194_v17 = vpop.f32.mrb[25].mxu0 }
 0x696   :  { %v1390_v18 = vadd.f32 %v1389_v7, %v3194_v17  ;;  %v1505_v1 = vmul.f32 %v3194_v17, %v3194_v17 }
 0x697   :  { %v1509_v37 = vadd.f32 %v1508_v10, %v1504_v15 }
 0x698   :  { %v1518_v43 = vadd.f32 %v1517_v12, %v1505_v1  ;;  %v3199_v50 = vpop.f32.mrb[26].mxu0  ;;  %v1600_v12 = vld [vmem:[%s3301_s12] sm:$0x1] }
 0x699   :  { %v1382_v19 = vadd.f32 %v1381_v14, %v3199_v50  ;;  %v1506_v20 = vmul.f32 %v3199_v50, %v3199_v50  ;;  %v3204_v21 = vpop.f32.mrb[27].mxu0 }
 0x69a   :  { %v1391_v22 = vadd.f32 %v1390_v18, %v3204_v21  ;;  %v1507_v23 = vmul.f32 %v3204_v21, %v3204_v21  ;;  %v1604_v18 = vld [vmem:[%s3302_s13] sm:$0x1] }
 0x69b   :  { %v1383_v24 = vrot.slane %v1382_v19, 4  ;;  %v1510_v26 = vadd.f32 %v1509_v37, %v1506_v20 }
 0x69c   :  { %v1392_v27 = vrot.slane %v1391_v22, 4  ;;  %v1519_v58 = vadd.f32 %v1518_v43, %v1507_v23 }
 0x69d   :  { %v1384_v62 = vadd.f32 %v1383_v24, %v1382_v19  ;;  %v1511_v28 = vrot.slane %v1510_v26, 4 }
 0x69e   :  { %v1393_v29 = vadd.f32 %v1392_v27, %v1391_v22  ;;  %v1520_v31 = vrot.slane %v1519_v58, 4 }
 0x69f   :  { %v1385_v32 = vrot.slane %v1384_v62, 2  ;;  %v1512_v33 = vadd.f32 %v1511_v28, %v1510_v26 }
 0x6a0   :  { %v1394_v59 = vrot.slane %v1393_v29, 2  ;;  %v1521_v34 = vadd.f32 %v1520_v31, %v1519_v58 }
 0x6a1   :  { %v1386_v35 = vadd.f32 %v1385_v32, %v1384_v62  ;;  %v1513_v36 = vrot.slane %v1512_v33, 2 }
 0x6a2   :  { %v1395_v38 = vadd.f32 %v1394_v59, %v1393_v29  ;;  %v1522_v4 = vrot.slane %v1521_v34, 2 }
 0x6a3   :  { %v1514_v39 = vadd.f32 %v1513_v36, %v1512_v33  ;;  %v1387_v40 = vrot.slane %v1386_v35, 1 }
 0x6a4   :  { %v1396_v41 = vrot.slane %v1395_v38, 1  ;;  %v1523_v42 = vadd.f32 %v1522_v4, %v1521_v34  ;;  %v2438_v4 = vld [vmem:[%s3290_s0 + $0x30] sm:$0xff] }
 0x6a5   :  { %v1515_v44 = vrot.slane %v1514_v39, 1  ;;  %v1388_v47 = vadd.f32 %v1387_v40, %v1386_v35  ;;  %v2439_v40 = vld [vmem:[%s3290_s0 + $0x8] sm:$0xff] }
 0x6a6   :  { %v1397_v45 = vadd.f32 %v1396_v41, %v1395_v38  ;;  %v1524_v46 = vrot.slane %v1523_v42, 1 }
 0x6a7   :  { %v1516_v49 = vadd.f32 %v1515_v44, %v1514_v39 }
 0x6a8   :  { %1494 = vmatprep.mubr.f32.mxu1 %v1397_v45  ;;  %v1525_v48 = vadd.f32 %v1524_v46, %v1523_v42  ;;  %v2440_v42 = vld [vmem:[%s3290_s0 + $0x18] sm:$0xff]  ;;  %v2441_v45 = vld [vmem:[%s3290_s0 + $0x28] sm:$0xff] }
 0x6a9   :  { %1495 = vmatmul.mubr.f32.vlgmr.msra.gmra.mrb[16].mxu1 %v1388_v47  ;;  %v2442_v47 = vld [vmem:[%s3290_s0 + $0x38] sm:$0xff] }
 0x6aa   :  { %1590 = vmatprep.mubr.f32.mxu0 %v1525_v48  ;;  %1679 = vmatprep.mubr.f32.mxu1 %v2445_v5 }
 0x6ab   :  { %1591 = vmatmul.mubr.f32.vlgmr.msra.gmra.mrb[28].mxu0 %v1516_v49  ;;  %2421 = vmatpush1.bf16.msra.mxu1 %v2420_v52 }
 0x6ac   :  { %2423 = vmatprep.subr.bf16.mxu1 %v2418_v25 }
 0x77c   :  { %v2022_v53 = vpop.f32.mrb[16].mxu1 }
 0x77d   :  { %v2023_v54 = vpop.f32.mrb[17].mxu1 }
 0x77e   :  { %v2024_v55 = vadd.f32 %v2023_v54, %v2022_v53  ;;  %v2057_v56 = vpop.f32.mrb[28].mxu0 }
 0x77f   :  { %v2058_v63 = vpop.f32.mrb[29].mxu0 }
 0x780   :  { %v1596_v0 = vmul.f32 0.001953125, %v2024_v55  ;;  %v2059_v2 = vadd.f32 %v2058_v63, %v2057_v56 }
 0x782   :  { %v1598_v6 = vmul.f32 %v1596_v0, %v1596_v0  ;;  %v1597_v7 = vmul.f32 0.001953125, %v2059_v2 }
 0x784   :  { %v1599_v9 = vsub.f32 %v1597_v7, %v1598_v6 }
 0x786   :  { %v1601_v10 = vadd.f32 1e-05, %v1599_v9 }
 0x788   :  { %2433 = vrsqrt.f32 %v1601_v10 }
 0x792   :  { %v2434_v14 = vpop.eup %2433 }
 0x793   :  { %v1603_v15 = vmul.f32 %v2434_v14, %v1600_v12 }
 0x795   :  { %1836 = vmatmul.mubr.msk.f32.vlgmr.msra.gmra.mrb[18].mxu1 %vm1611_vm9, %v1603_v15  ;;  %v1605_v1 = vmul.f32 %v1603_v15, %v1596_v0 }
 0x796   :  { %2425 = vmatpush1.bf16.msra.mxu1 %v2420_v52  ;;  %1753 = vmatprep.mubr.f32.mxu1 %v2445_v5 }
 0x797   :  { %v1606_v37 = vsub.f32 %v1604_v18, %v1605_v1 }
 0x799   :  { %1837 = vmatmul.mubr.msk.f32.vlgmr.msra.gmra.mrb[20].mxu1 %vm1611_vm9, %v1606_v37 }
 0x868   :  { %v1681_v43 = vpop.f32.mrb[18].mxu1 }
 0x869   :  { %v1763_v19 = vrot.slane %v1681_v43, %v2902_v30  ;;  %v1683_v20 = vpop.f32.mrb[19].mxu1 }
 0x86a   :  { %v1767_v22 = vrot.slane %v1683_v20, %v2902_v30 }
 0x86b   :  { %v1768_v23 = vmul.f32 %v1763_v19, %v3169_v57  ;;  %v1770_v24 = vmul.f32 %v1763_v19, %v3173_v61  ;;  %v1772_v26 = vmul.f32 %v1763_v19, %v3189_v13  ;;  %v1774_v27 = vmul.f32 %v1763_v19, %v3199_v50 }
 0x86c   :  { %v1769_v58 = vmul.f32 %v1767_v22, %v3171_v60  ;;  %v1771_v5 = vmul.f32 %v1767_v22, %v3181_v3  ;;  %v1773_v62 = vmul.f32 %v1767_v22, %v3194_v17  ;;  %v1775_v28 = vmul.f32 %v1767_v22, %v3204_v21  ;;  %v1755_v29 = vpop.f32.mrb[20].mxu1  ;;  %v2435_v3 = vld [vmem:[%s3290_s0] sm:$0xff]  ;;  %v2436_v21 = vld [vmem:[%s3290_s0 + $0x10] sm:$0xff] }
 0x86d   :  { %v1779_v31 = vrot.slane %v1755_v29, %v2902_v30  ;;  %v1757_v32 = vpop.f32.mrb[21].mxu1 }
 0x86e   :  { %v1783_v57 = vrot.slane %v1757_v32, %v2902_v30  ;;  %v2437_v30 = vld [vmem:[%s3290_s0 + $0x20] sm:$0xff] }
 0x86f   :  { %v1784_v33 = vadd.f32 %v1779_v31, %v1768_v23  ;;  %v1786_v61 = vadd.f32 %v1779_v31, %v1770_v24  ;;  %v1788_v59 = vadd.f32 %v1779_v31, %v1772_v26  ;;  %v1790_v13 = vadd.f32 %v1779_v31, %v1774_v27 }
 0x870   :  { %v1785_v34 = vadd.f32 %v1783_v57, %v1769_v58  ;;  %v1787_v50 = vadd.f32 %v1783_v57, %v1771_v5  ;;  %v1789_v35 = vadd.f32 %v1783_v57, %v1773_v62  ;;  %v1791_v60 = vadd.f32 %v1783_v57, %v1775_v28 }
 0x871   :  { %v1792_v17 = vadd.f32 %v2435_v3, %v1784_v33  ;;  %v1794_v36 = vadd.f32 %v2436_v21, %v1786_v61  ;;  %v1796_v38 = vadd.f32 %v2437_v30, %v1788_v59  ;;  %v1798_v39 = vadd.f32 %v2438_v4, %v1790_v13 }
 0x872   :  { %v1793_v41 = vadd.f32 %v2439_v40, %v1785_v34  ;;  %v1795_v44 = vadd.f32 %v2440_v42, %v1787_v50  ;;  %v1797_v46 = vadd.f32 %v2441_v45, %v1789_v35  ;;  %v1799_v48 = vadd.f32 %v2442_v47, %v1791_v60 }
 0x873   :  { %v1800_v49 = vmax.f32 %v1792_v17, 0.0  ;;  %v1802_v8 = vmax.f32 %v1794_v36, 0.0  ;;  %v1804_v11 = vmax.f32 %v1796_v38, 0.0  ;;  %v1806_v16 = vmax.f32 %v1798_v39, 0.0 }
 0x874   :  { %v1801_v25 = vmax.f32 %v1793_v41, 0.0  ;;  %v1803_v51 = vmax.f32 %v1795_v44, 0.0  ;;  %v1805_v52 = vmax.f32 %v1797_v46, 0.0  ;;  %v1807_v53 = vmax.f32 %v1799_v48, 0.0 }
 0x875   :  { %1808 = vst [vmem:[%s3303_s14] sm:$0xff] %v1800_v49  ;;  %1810 = vst [vmem:[%s3303_s14 + $0x10] sm:$0xff] %v1802_v8 }
 0x876   :  { %1812 = vst [vmem:[%s3303_s14 + $0x20] sm:$0xff] %v1804_v11  ;;  %1814 = vst [vmem:[%s3303_s14 + $0x30] sm:$0xff] %v1806_v16 }
 0x877   :  { %1809 = vst [vmem:[%s3303_s14 + $0x8] sm:$0xff] %v1801_v25  ;;  %1811 = vst [vmem:[%s3303_s14 + $0x18] sm:$0xff] %v1803_v51 }
 0x878   :  { %1813 = vst [vmem:[%s3303_s14 + $0x28] sm:$0xff] %v1805_v52  ;;  %1815 = vst [vmem:[%s3303_s14 + $0x38] sm:$0xff] %v1807_v53 }

</bundles_post_ra>
